<compile_context>
chip_gen: v7x
topology: tpu7x:2x2x1
jax: 0.10.0
libtpu: 0.0.40
codegen_flags: <defaults>
</compile_context>

<pallas_src>
import functools

import jax
import jax.numpy as jnp
from jax.experimental import pallas as pl
from jax.experimental.pallas import tpu as pltpu


# ----------------------------------------------------------------------------
# Grouped SwiGLU expert kernel.
#   grid = (num_row_tiles, n_h).  Row tile m holds tile_t (token, assignment)
#   rows that all belong to the same (pseudo-)expert te[m]; the hidden
#   dimension is tiled along the inner grid axis and accumulated in f32 VMEM.
# ----------------------------------------------------------------------------
def _grouped_moe_kernel(te_ref, x_ref, wgt_ref, w13_ref, w2_ref, out_ref,
                        acc_ref, *, n_h, tile_h):
    h = pl.program_id(1)

    @pl.when(h == 0)
    def _init():
        acc_ref[...] = jnp.zeros_like(acc_ref)

    x = x_ref[...]                                                # (tT, D) bf16
    # fused gate/up projection: one matmul of width 2*tile_h (better MXU fill)
    h13 = jnp.dot(x, w13_ref[0, 0], preferred_element_type=jnp.float32)
    h1 = h13[:, :tile_h]
    h3 = h13[:, tile_h:]
    # SwiGLU; per-row combine weight applied to the (tT, tile_h) activation
    # (cheaper than scaling the (tT, D) output).
    hact = (h1 * jax.nn.sigmoid(h1)) * h3 * wgt_ref[...]
    acc_ref[...] += jnp.dot(hact.astype(x.dtype), w2_ref[0, 0],
                            preferred_element_type=jnp.float32)

    @pl.when(h == n_h - 1)
    def _fin():
        out_ref[...] = acc_ref[...]


def grouped_moe_mlp(xs, wgts, tile_expert, w13_all, w2_all,
                    *, tile_t, tile_h, vmem_limit_bytes=64 * 1024 * 1024):
    """xs: [P, D] bf16 rows grouped by expert (P multiple of tile_t);
    wgts: [P, 1] f32 per-row combine weights (0 for padding rows);
    tile_expert: [P // tile_t] int32 expert id per row tile (scalar prefetch);
    w13_all: [E', n_h, D, 2*tile_h]; w2_all: [E', n_h, tile_h, D]."""
    P, D = xs.shape
    n_h = w13_all.shape[1]
    num_tiles = P // tile_t
    kernel = functools.partial(_grouped_moe_kernel, n_h=n_h, tile_h=tile_h)

    return pl.pallas_call(
        kernel,
        out_shape=jax.ShapeDtypeStruct((P, D), jnp.float32),
        grid_spec=pltpu.PrefetchScalarGridSpec(
            num_scalar_prefetch=1,
            grid=(num_tiles, n_h),
            in_specs=[
                pl.BlockSpec((tile_t, D), lambda m, h, te: (m, 0)),          # rows
                pl.BlockSpec((tile_t, 1), lambda m, h, te: (m, 0)),          # row weights
                pl.BlockSpec((1, 1, D, 2 * tile_h),
                             lambda m, h, te: (te[m], h, 0, 0)),             # fused w1|w3
                pl.BlockSpec((1, 1, tile_h, D),
                             lambda m, h, te: (te[m], h, 0, 0)),             # w2
            ],
            out_specs=pl.BlockSpec((tile_t, D), lambda m, h, te: (m, 0)),
            scratch_shapes=[pltpu.VMEM((tile_t, D), jnp.float32)],
        ),
        compiler_params=pltpu.CompilerParams(
            dimension_semantics=("parallel", "arbitrary"),
            vmem_limit_bytes=vmem_limit_bytes),
    )(tile_expert, xs, wgts, w13_all, w2_all)


# ----------------------------------------------------------------------------
# Host-side pre-tiled weight stream: routed experts + shared pseudo-experts.
# Every (1, 1, D, 2*tile_h) / (1, 1, tile_h, D) block is contiguous in HBM.
# ----------------------------------------------------------------------------
def _build_weight_stream(params, num_shared, n_h, tile_h):
    w1, w3, w2 = params["w1"], params["w3"], params["w2"]        # (E,D,H)x2, (E,H,D)
    E, D, H = w1.shape
    w1t = w1.reshape(E, D, n_h, tile_h).transpose(0, 2, 1, 3)     # (E, n_h, D, th)
    w3t = w3.reshape(E, D, n_h, tile_h).transpose(0, 2, 1, 3)
    w13 = jnp.concatenate([w1t, w3t], axis=-1)                    # (E, n_h, D, 2*th)
    w2t = w2.reshape(E, n_h, tile_h, D)                           # (E, n_h, th, D)
    if num_shared > 0:
        w1s, w3s, w2s = params["w1s"], params["w3s"], params["w2s"]
        # shared hidden = num_shared * H; pseudo-expert j uses columns [j*H:(j+1)*H]
        w1st = w1s.reshape(D, num_shared, n_h, tile_h).transpose(1, 2, 0, 3)
        w3st = w3s.reshape(D, num_shared, n_h, tile_h).transpose(1, 2, 0, 3)
        w13s = jnp.concatenate([w1st, w3st], axis=-1)             # (ns, n_h, D, 2*th)
        w2st = w2s.reshape(num_shared, n_h, tile_h, D)
        w13 = jnp.concatenate([w13, w13s], axis=0)
        w2t = jnp.concatenate([w2t, w2st], axis=0)
    return w13, w2t


# ----------------------------------------------------------------------------
# Full Qwen2MoE forward: routing / bucketing glue in plain JAX, expert math in
# the grouped Pallas kernel, combine via segment_sum.
# ----------------------------------------------------------------------------
@functools.partial(jax.jit, static_argnames=("top_k", "num_shared_experts",
                                             "tile_t", "tile_h"))
def qwen2_moe_forward(hidden_states, params, *, top_k, num_shared_experts,
                      tile_t=128, tile_h=128):
    B, S, D = hidden_states.shape
    x = hidden_states.reshape(B * S, D)
    T = B * S
    E, _, H = params["w1"].shape
    ns = num_shared_experts
    assert H % tile_h == 0 and tile_h % 128 == 0 and tile_t % 8 == 0
    n_h = H // tile_h
    Ep = E + ns                                       # routed + shared pseudo-experts

    # --- router (gate is fp32 in the reference: set_fp32_attr_to_module) -----
    logits = jnp.dot(x.astype(jnp.float32), params["gate_w"])          # (T, E)
    probs = jax.nn.softmax(logits, axis=-1)
    topk_p, topk_idx = jax.lax.top_k(probs, top_k)                     # (T, k)
    topk_p = topk_p / jnp.sum(topk_p, axis=-1, keepdims=True)          # norm_topk_prob

    # --- build (token, expert, weight) assignments ----------------------------
    tok_r = jnp.broadcast_to(jnp.arange(T, dtype=jnp.int32)[:, None],
                             (T, top_k)).reshape(-1)
    exp_r = topk_idx.reshape(-1).astype(jnp.int32)
    wgt_r = topk_p.reshape(-1)
    if ns > 0:
        coef = jnp.dot(x.astype(jnp.float32), params["wc"].astype(jnp.float32))
        sig = jax.nn.sigmoid(coef)[:, 0]                               # (T,)
        tok_s = jnp.tile(jnp.arange(T, dtype=jnp.int32), ns)
        exp_s = E + jnp.repeat(jnp.arange(ns, dtype=jnp.int32), T)
        wgt_s = jnp.tile(sig, ns)
        tok = jnp.concatenate([tok_r, tok_s])
        exp = jnp.concatenate([exp_r, exp_s])
        wgt = jnp.concatenate([wgt_r, wgt_s])
    else:
        tok, exp, wgt = tok_r, exp_r, wgt_r
    A = tok.shape[0]

    # --- bucket by expert; pad each group to a multiple of tile_t ------------
    order = jnp.argsort(exp)
    exp_sorted = exp[order]
    tok_sorted = tok[order]
    wgt_sorted = wgt[order]

    counts = jnp.sum((exp[:, None] == jnp.arange(Ep)[None, :]), axis=0)        # (Ep,)
    group_start = jnp.concatenate([jnp.zeros((1,), counts.dtype),
                                   jnp.cumsum(counts)[:-1]])
    padded_counts = ((counts + tile_t - 1) // tile_t) * tile_t
    padded_start = jnp.concatenate([jnp.zeros((1,), padded_counts.dtype),
                                    jnp.cumsum(padded_counts)[:-1]])

    num_tiles = -(-A // tile_t) + Ep          # static upper bound on padded tiles
    P = num_tiles * tile_t

    rank = jnp.arange(A, dtype=jnp.int32) - group_start[exp_sorted].astype(jnp.int32)
    dest = (padded_start[exp_sorted].astype(jnp.int32) + rank)

    toks_p = jnp.zeros((P,), jnp.int32).at[dest].set(tok_sorted)      # pad -> token 0
    wgts_p = jnp.zeros((P,), jnp.float32).at[dest].set(wgt_sorted)    # pad -> weight 0

    tile_start = jnp.arange(num_tiles, dtype=jnp.int32) * tile_t
    tile_expert = jnp.sum((tile_start[:, None] >=
                           padded_start[None, :].astype(jnp.int32)).astype(jnp.int32),
                          axis=1) - 1
    tile_expert = jnp.clip(tile_expert, 0, Ep - 1).astype(jnp.int32)

    xs = jnp.take(x, toks_p, axis=0)                                  # (P, D) gather

    # --- expert compute (Pallas) ---------------------------------------------
    w13_all, w2_all = _build_weight_stream(params, ns, n_h, tile_h)
    ys = grouped_moe_mlp(xs, wgts_p[:, None], tile_expert, w13_all, w2_all,
                         tile_t=tile_t, tile_h=tile_h)                # (P, D) f32

    # --- combine back per token ------------------------------------------------
    out_flat = jax.ops.segment_sum(ys, toks_p, num_segments=T)        # (T, D) f32
    out = out_flat.astype(hidden_states.dtype).reshape(B, S, D)

    # --- aux loss & expert counts (routed experts only) ------------------------
    one_hot = jax.nn.one_hot(topk_idx, E, dtype=jnp.float32)          # (T, k, E)
    frac_tokens = jnp.mean(jnp.sum(one_hot, axis=1), axis=0) / top_k
    mean_prob = jnp.mean(probs, axis=0)
    l_aux = E * jnp.sum(frac_tokens * mean_prob)
    exp_counts = jnp.sum(one_hot, axis=(0, 1)).astype(jnp.int32)

    return out, l_aux, exp_counts


# ----------------------------------------------------------------------------
# Pure-JAX reference (torch-style ordering of casts/combines) for correctness.
# ----------------------------------------------------------------------------
def _reference_forward(x, params, top_k, num_shared_experts):
    f32 = jnp.float32
    xf = x.astype(f32)
    E = params["w1"].shape[0]
    logits = xf @ params["gate_w"]
    probs = jax.nn.softmax(logits, axis=-1)
    topk_p, topk_idx = jax.lax.top_k(probs, top_k)
    topk_p = topk_p / jnp.sum(topk_p, axis=-1, keepdims=True)
    gw = jnp.einsum("tk,tke->te", topk_p, jax.nn.one_hot(topk_idx, E, dtype=f32))
    out = jnp.zeros_like(xf)
    for e in range(E):
        h1 = xf @ params["w1"][e].astype(f32)
        h3 = xf @ params["w3"][e].astype(f32)
        h = (h1 * jax.nn.sigmoid(h1)) * h3
        y = h.astype(x.dtype).astype(f32) @ params["w2"][e].astype(f32)
        out = out + gw[:, e:e + 1] * y
    if num_shared_experts > 0:
        h1 = xf @ params["w1s"].astype(f32)
        h3 = xf @ params["w3s"].astype(f32)
        h = (h1 * jax.nn.sigmoid(h1)) * h3
        ys = h.astype(x.dtype).astype(f32) @ params["w2s"].astype(f32)
        coef = xf @ params["wc"].astype(f32)
        out = out + jax.nn.sigmoid(coef) * ys
    return out


# ----------------------------------------------------------------------------
# Deterministic parameter construction (synthetic; shapes follow __init__).
# Weights are stored transposed w.r.t. torch.nn.Linear, i.e. [in, out].
# ----------------------------------------------------------------------------
def make_params(key, *, in_features, hidden_features, out_features,
                num_experts, num_shared_experts, dtype=jnp.bfloat16):
    ks = jax.random.split(key, 8)
    scale = 0.05
    Hs = hidden_features * num_shared_experts
    p = {
        "gate_w": scale * jax.random.normal(ks[0], (in_features, num_experts), jnp.float32),
        "w1": (scale * jax.random.normal(ks[1], (num_experts, in_features, hidden_features))).astype(dtype),
        "w3": (scale * jax.random.normal(ks[2], (num_experts, in_features, hidden_features))).astype(dtype),
        "w2": (scale * jax.random.normal(ks[3], (num_experts, hidden_features, out_features))).astype(dtype),
    }
    if num_shared_experts > 0:
        p["w1s"] = (scale * jax.random.normal(ks[4], (in_features, Hs))).astype(dtype)
        p["w3s"] = (scale * jax.random.normal(ks[5], (in_features, Hs))).astype(dtype)
        p["w2s"] = (scale * jax.random.normal(ks[6], (Hs, out_features))).astype(dtype)
        p["wc"] = (scale * jax.random.normal(ks[7], (in_features, 1))).astype(dtype)
    return p


if __name__ == "__main__":
    # small demo shapes: batch=2, seq=128, hidden=128, expert hidden=256,
    # num_experts=4, top_k=2, num_shared_experts=2 (shared hidden = 512)
    B, S, D, H = 2, 128, 128, 256
    E, K, NSHARED = 4, 2, 2
    TILE_T, TILE_H = 128, 128   # production: see per-chip guidance at top of file

    key = jax.random.PRNGKey(0)
    k_x, k_p = jax.random.split(key)
    hidden_states = jax.random.normal(k_x, (B, S, D)).astype(jnp.bfloat16)
    params = make_params(k_p, in_features=D, hidden_features=H, out_features=D,
                         num_experts=E, num_shared_experts=NSHARED,
                         dtype=jnp.bfloat16)

    out, l_aux, exp_counts = qwen2_moe_forward(
        hidden_states, params, top_k=K, num_shared_experts=NSHARED,
        tile_t=TILE_T, tile_h=TILE_H)
    jax.block_until_ready((out, l_aux, exp_counts))

    assert out.shape == (B, S, D)
    assert exp_counts.shape == (E,)
    assert jnp.isfinite(out.astype(jnp.float32)).all() and jnp.isfinite(l_aux)
    assert int(jnp.sum(exp_counts)) == B * S * K

    # correctness check against a pure-JAX reference (bf16-tolerant)
    ref = _reference_forward(hidden_states.reshape(B * S, D), params,
                             top_k=K, num_shared_experts=NSHARED).reshape(B, S, D)
    assert bool(jnp.allclose(out.astype(jnp.float32), ref, atol=2e-2, rtol=2e-2))

    print("KERNEL_OK")
</pallas_src>

<mosaic_0001>
module attributes {stable_mosaic.version = 11 : i64} {
  func.func @_grouped_moe_kernel(%arg0: i32, %arg1: i32, %arg2: memref<14xi32, #tpu.memory_space<smem>>, %arg3: memref<128x128xbf16, #tpu.memory_space<vmem>>, %arg4: memref<128x1xf32, #tpu.memory_space<vmem>>, %arg5: memref<1x1x128x256xbf16, #tpu.memory_space<vmem>>, %arg6: memref<1x1x128x128xbf16, #tpu.memory_space<vmem>>, %arg7: memref<128x128xf32, #tpu.memory_space<vmem>>, %arg8: memref<128x128xf32, #tpu.memory_space<vmem>>) attributes {dimension_semantics = [#tpu.dimension_semantics<parallel>, #tpu.dimension_semantics<arbitrary>], iteration_bounds = array<i64: 14, 2>, scalar_prefetch = 1 : i64, scratch_operands = 1 : i64, tpu.core_type = #tpu.core_type<tc>, window_params = [{transform_indices = @transform_0, window_bounds = array<i64: 128, 128>}, {transform_indices = @transform_1, window_bounds = array<i64: 128, 1>}, {transform_indices = @transform_2, window_bounds = array<i64: 1, 1, 128, 256>}, {transform_indices = @transform_3, window_bounds = array<i64: 1, 1, 128, 128>}, {transform_indices = @transform_4, window_bounds = array<i64: 128, 128>}]} {
    %c0_i32 = arith.constant 0 : i32
    %0 = arith.cmpi eq, %arg1, %c0_i32 : i32
    %1 = arith.extui %0 : i1 to i32
    %c0_i32_0 = arith.constant 0 : i32
    %2 = arith.cmpi ne, %1, %c0_i32_0 : i32
    scf.if %2 {
      %cst_19 = arith.constant 0.000000e+00 : f32
      %29 = vector.broadcast %cst_19 : f32 to vector<128x128xf32>
      %c0_20 = arith.constant 0 : index
      %c0_21 = arith.constant 0 : index
      %30 = vector.load %arg8[%c0_20, %c0_21] : memref<128x128xf32, #tpu.memory_space<vmem>>, vector<128x128xf32>
      tpu.vector_store %arg8[%c0_20, %c0_21], %29 {strides = array<i32>} : memref<128x128xf32, #tpu.memory_space<vmem>>, vector<128x128xf32>,
    } else {
    }
    %c0 = arith.constant 0 : index
    %c0_1 = arith.constant 0 : index
    %3 = vector.load %arg3[%c0, %c0_1] : memref<128x128xbf16, #tpu.memory_space<vmem>>, vector<128x128xbf16>
    %c0_2 = arith.constant 0 : index
    %c0_3 = arith.constant 0 : index
    %c0_4 = arith.constant 0 : index
    %c0_5 = arith.constant 0 : index
    %4 = vector.load %arg5[%c0_2, %c0_3, %c0_4, %c0_5] : memref<1x1x128x256xbf16, #tpu.memory_space<vmem>>, vector<1x1x128x256xbf16>
    %5 = vector.shape_cast %4 : vector<1x1x128x256xbf16> to vector<128x256xbf16>
    %cst = arith.constant dense<0.000000e+00> : vector<128x256xf32>
    %6 = tpu.matmul %3, %5, %cst {dimension_numbers = #tpu.dot_dimension_numbers<[1], [0], [0], [1], [0, 0, 1, 1], [], []>} : vector<128x128xbf16>, vector<128x256xbf16>, vector<128x256xf32> -> vector<128x256xf32>
    %7 = vector.extract_strided_slice %6 {offsets = [0, 0], sizes = [128, 128], strides = [1, 1]} : vector<128x256xf32> to vector<128x128xf32>
    %8 = vector.extract_strided_slice %6 {offsets = [0, 128], sizes = [128, 128], strides = [1, 1]} : vector<128x256xf32> to vector<128x128xf32>
    %9 = arith.negf %7 : vector<128x128xf32>
    %10 = math.exp %9 : vector<128x128xf32>
    %cst_6 = arith.constant 1.000000e+00 : f32
    %11 = vector.broadcast %cst_6 : f32 to vector<128x128xf32>
    %12 = arith.addf %11, %10 : vector<128x128xf32>
    %13 = arith.divf %11, %12 : vector<128x128xf32>
    %14 = arith.mulf %7, %13 : vector<128x128xf32>
    %15 = arith.mulf %14, %8 : vector<128x128xf32>
    %c0_7 = arith.constant 0 : index
    %c0_8 = arith.constant 0 : index
    %16 = vector.load %arg4[%c0_7, %c0_8] : memref<128x1xf32, #tpu.memory_space<vmem>>, vector<128x1xf32>
    %17 = vector.broadcast %16 : vector<128x1xf32> to vector<128x128xf32>
    %18 = arith.mulf %15, %17 : vector<128x128xf32>
    %c0_9 = arith.constant 0 : index
    %c0_10 = arith.constant 0 : index
    %19 = vector.load %arg8[%c0_9, %c0_10] : memref<128x128xf32, #tpu.memory_space<vmem>>, vector<128x128xf32>
    %20 = arith.truncf %18 : vector<128x128xf32> to vector<128x128xbf16>
    %c0_11 = arith.constant 0 : index
    %c0_12 = arith.constant 0 : index
    %c0_13 = arith.constant 0 : index
    %c0_14 = arith.constant 0 : index
    %21 = vector.load %arg6[%c0_11, %c0_12, %c0_13, %c0_14] : memref<1x1x128x128xbf16, #tpu.memory_space<vmem>>, vector<1x1x128x128xbf16>
    %22 = vector.shape_cast %21 : vector<1x1x128x128xbf16> to vector<128x128xbf16>
    %cst_15 = arith.constant dense<0.000000e+00> : vector<128x128xf32>
    %23 = tpu.matmul %20, %22, %cst_15 {dimension_numbers = #tpu.dot_dimension_numbers<[1], [0], [0], [1], [0, 0, 1, 1], [], []>} : vector<128x128xbf16>, vector<128x128xbf16>, vector<128x128xf32> -> vector<128x128xf32>
    %24 = arith.addf %19, %23 : vector<128x128xf32>
    %c0_16 = arith.constant 0 : index
    %c0_17 = arith.constant 0 : index
    %25 = vector.load %arg8[%c0_16, %c0_17] : memref<128x128xf32, #tpu.memory_space<vmem>>, vector<128x128xf32>
    tpu.vector_store %arg8[%c0_16, %c0_17], %24 {strides = array<i32>} : memref<128x128xf32, #tpu.memory_space<vmem>>, vector<128x128xf32>,
    %c1_i32 = arith.constant 1 : i32
    %26 = arith.cmpi eq, %arg1, %c1_i32 : i32
    %27 = arith.extui %26 : i1 to i32
    %c0_i32_18 = arith.constant 0 : i32
    %28 = arith.cmpi ne, %27, %c0_i32_18 : i32
    scf.if %28 {
      %c0_19 = arith.constant 0 : index
      %c0_20 = arith.constant 0 : index
      %29 = vector.load %arg8[%c0_19, %c0_20] : memref<128x128xf32, #tpu.memory_space<vmem>>, vector<128x128xf32>
      %c0_21 = arith.constant 0 : index
      %c0_22 = arith.constant 0 : index
      %30 = vector.load %arg7[%c0_21, %c0_22] : memref<128x128xf32, #tpu.memory_space<vmem>>, vector<128x128xf32>
      tpu.vector_store %arg7[%c0_21, %c0_22], %29 {strides = array<i32>} : memref<128x128xf32, #tpu.memory_space<vmem>>, vector<128x128xf32>,
    } else {
    }
    return
  }
  func.func @transform_0(%arg0: i32, %arg1: i32, %arg2: memref<14xi32, #tpu.memory_space<smem>>) -> (i32, i32) {
    %c0_i32 = arith.constant 0 : i32
    %c0_i32_0 = arith.constant 0 : i32
    return %arg0, %c0_i32 : i32, i32
  }
  func.func @transform_1(%arg0: i32, %arg1: i32, %arg2: memref<14xi32, #tpu.memory_space<smem>>) -> (i32, i32) {
    %c0_i32 = arith.constant 0 : i32
    %c0_i32_0 = arith.constant 0 : i32
    return %arg0, %c0_i32 : i32, i32
  }
  func.func @transform_2(%arg0: i32, %arg1: i32, %arg2: memref<14xi32, #tpu.memory_space<smem>>) -> (i32, i32, i32, i32) {
    %0 = arith.index_cast %arg0 : i32 to index
    %1 = memref.load %arg2[%0] : memref<14xi32, #tpu.memory_space<smem>>
    %c0_i32 = arith.constant 0 : i32
    %c0_i32_0 = arith.constant 0 : i32
    %c0_i32_1 = arith.constant 0 : i32
    return %1, %arg1, %c0_i32, %c0_i32_0 : i32, i32, i32, i32
  }
  func.func @transform_3(%arg0: i32, %arg1: i32, %arg2: memref<14xi32, #tpu.memory_space<smem>>) -> (i32, i32, i32, i32) {
    %0 = arith.index_cast %arg0 : i32 to index
    %1 = memref.load %arg2[%0] : memref<14xi32, #tpu.memory_space<smem>>
    %c0_i32 = arith.constant 0 : i32
    %c0_i32_0 = arith.constant 0 : i32
    %c0_i32_1 = arith.constant 0 : i32
    return %1, %arg1, %c0_i32, %c0_i32_0 : i32, i32, i32, i32
  }
  func.func @transform_4(%arg0: i32, %arg1: i32, %arg2: memref<14xi32, #tpu.memory_space<smem>>) -> (i32, i32) {
    %c0_i32 = arith.constant 0 : i32
    %c0_i32_0 = arith.constant 0 : i32
    return %arg0, %c0_i32 : i32, i32
  }
}

</mosaic_0001>

<bundles_post_ra>
// kernel: custom-call
= control target key start
LH: loop header
LB: loop body
LE: loop exit
PB: predicated region body
PF: predicated region fallthrough
CT: control target
= control target key end

     0   :  { %s6_s0 = inlined_call_operand.vmem [shape: s32[1024], index: 0, kind: output, shape index: {}]  }

// kernel: qwen2_moe_forward.1
= control target key start
LH: loop header
LB: loop body
LE: loop exit
PB: predicated region body
PF: predicated region fallthrough
CT: control target
= control target key end

     0   :  { %s2723_s0 = inlined_call_operand.hbm [shape: s32[14], index: 0, kind: input, shape index: {}]   ;;  %s2724_s1 = inlined_call_operand.hbm [shape: bf16[1792,128], index: 1, kind: input, shape index: {}]   ;;  %s2725_s2 = inlined_call_operand.hbm [shape: f32[1792,1], index: 2, kind: input, shape index: {}]   ;;  %s2726_s3 = inlined_call_operand.hbm [shape: bf16[6,2,128,256], index: 3, kind: input, shape index: {}]   ;;  %s2727_s4 = inlined_call_operand.hbm [shape: bf16[6,2,128,128], index: 4, kind: input, shape index: {}]   ;;  %s2728_s5 = inlined_call_operand.hbm [shape: f32[1792,128], index: 5, kind: output, shape index: {}]  }
   0x1   :  { %2751 = sst [smem:[#allocation35_spill]] %s2724_s1  ;;  %s1720_s20 = scalar_lea.hbm %s2723_s0, 16 }
   0x2   :  { %2752 = sst [smem:[#allocation36_spill]] %s2725_s2  ;;  %p1721_p0 = scmp.ne.s32.totalorder %s2723_s0, %s1720_s20 }
   0x3   :  { %2753 = sst [smem:[#allocation37_spill]] %s2726_s3  ;;  %p1724_p1 = scmp.lt.u32.totalorder %s1720_s20, %s2723_s0 }
   0x4   :  { %2754 = sst [smem:[#allocation38_spill]] %s2728_s5 }
   0x5   :  { %p1726_p2 = pnand %p1724_p1, %p1721_p0 }
   0x7   :  { %1729 = shalt.err (!%p1726_p2)  }
   0x8   :  { %s2012_s25 = smov [#allocation4]  }
   0x9   :  { %11 = dma.hbm_to_smem %s2723_s0, 16, %s2012_s25, [#allocation3] }
   0xa   :  { %1934 = dma.done.wait [#allocation3], 16 }
   0xb   :  { %1935 = vsyncadd [#allocation3], 4294967280 }
   0xc   :  { %13 = sfence }
   0xd   :  { %14 = vsyncpa [#allocation6], 0 }
   0xe   :  { %16 = vsyncpa [#allocation6 + $0x1], 0 }
   0xf   :  { %17 = vsyncpa [#allocation9], 0 }
  0x10   :  { %19 = vsyncpa [#allocation9 + $0x1], 0 }
  0x11   :  { %20 = vsyncpa [#allocation12], 0 }
  0x12   :  { %22 = vsyncpa [#allocation12 + $0x1], 0 }
  0x13   :  { %23 = vsyncpa [#allocation7], 0 }
  0x14   :  { %25 = vsyncpa [#allocation7 + $0x1], 0  ;;  %s2068_s28 = smov 0   ;;  %s2070_s29 = smov 0  }
  0x15   :  { %s2072_s30 = smov 0   ;;  %s2074_s6 = smov 0  }
  0x16   :  { %s2076_s0 = smov 0   ;;  %s2078_s7 = smov 0  }
  0x17   :  { %s2080_s8 = smov 0   ;;  %s2082_s9 = smov 0  }
  0x18   :  { %s2084_s10 = smov 0   ;;  %s2086_s11 = smov 0  }
  0x19   :  { %s2088_s12 = smov 0   ;;  %s2090_s13 = smov 0  }
  0x1a   :  { %s2092_s14 = smov 0   ;;  %s2094_s15 = smov 0  }
  0x1b LB: > { %2755 = sst [smem:[#allocation24_spill]] %s1974_s0  ;;  %s2139_s16 = sadd.s32 4294967295, %s2010_s15   ;;  %s2010_s15 = sphi %s2094_s15, %s31_s15   ;;  %s2006_s14 = sphi %s2092_s14, %s2826_s14   ;;  %s2002_s13 = sphi %s2090_s13, %s2825_s13   ;;  %s1998_s12 = sphi %s2088_s12, %s2824_s12   ;;  %s1994_s11 = sphi %s2086_s11, %s2823_s11   ;;  %s1990_s10 = sphi %s2084_s10, %s2812_s10   ;;  %s1986_s9 = sphi %s2082_s9, %s2822_s9   ;;  %s1982_s8 = sphi %s2080_s8, %s2821_s8   ;;  %s1978_s7 = sphi %s2078_s7, %s2820_s7   ;;  %s1974_s0 = sphi %s2076_s0, %s2819_s0   ;;  %s1970_s6 = sphi %s2074_s6, %s2810_s6   ;;  %s1966_s30 = sphi %s2072_s30, %s2818_s30   ;;  %s1962_s29 = sphi %s2070_s29, %s2817_s29   ;;  %s1958_s28 = sphi %s2068_s28, %s2816_s28  }
  0x1c   : > { %2756 = sst [smem:[#allocation25_spill]] %s1982_s8  ;;  %s1327_s17 = sadd.s32 4294967294, %s2010_s15  }
  0x1d   : > { %2757 = sst [smem:[#allocation26_spill]] %s1990_s10  ;;  %p57_p3 = scmp.ne.s32.totalorder %s1990_s10, %s1986_s9 }
  0x1e   : > { %2758 = sst [smem:[#allocation27_spill]] %s1994_s11  ;;  %p2736_p4 = scmp.eq.s32.totalorder %s2010_s15, 0 }
  0x1f   : > { %2759 = sst [smem:[#allocation28_spill]] %s1998_s12  ;;  %p63_p5 = scmp.ne.s32.totalorder %s1986_s9, %s1982_s8 }
  0x20   : > { %p2735_p6 = scmp.eq.s32.totalorder %s2139_s16, 0  ;;  %p173_p7 = scmp.eq.s32.totalorder %s2139_s16, 27 }
  0x21   : > { %p59_p8 = por %p2736_p4, %p57_p3  ;;  %p179_p9 = scmp.eq.s32.totalorder %s1327_s17, 27 }
  0x22   : > { %p2153_p10 = por %p2735_p6, %p63_p5  ;;  %p2157_p11 = por %p173_p7, %p57_p3 }
  0x23   : > { %p2161_p12 = por %p179_p9, %p63_p5  ;;  %p2734_p13 = scmp.lt.s32.totalorder %s2010_s15, 28 }
  0x24   : > { %s2760_s18 = scalar_select %p2153_p10, 1, 0 }
  0x25   : > { %s2761_s19 = scalar_select %p2157_p11, 1, 0 }
  0x26   : > { %s2763_s20 = scalar_select %p2161_p12, 1, 0 }
  0x27   : > { %2762 = sst [smem:[#allocation29_spill]] %s2761_s19  ;;  %s2167_s21 = sand.u32 1, %s1990_s10  }
  0x28   : > { %2764 = sst [smem:[#allocation30_spill]] %s2763_s20  ;;  %s220_s22 = sand.u32 1, %s2010_s15  }
  0x29   : > { %s1333_s23 = sshll.u32 %s2167_s21, 7  ;;  %p2173_p0 = pnand %p2734_p13, %p59_p8 }
  0x2a   : > { %s1406_s25 = sshll.u32 %s2006_s14, 11  ;;  %s2766_s2 = sld [smem:[#allocation36_spill]] }
  0x2b   : > { %s224_s20 = scalar_lea.vmem [#allocation8], %s1333_s23  ;;  %s2185_s5 = scalar_lea.sflag [#allocation9], %s220_s22 }
  0x2c   : > { %s231_s8 = sshll.u32 %s224_s20, 4  ;;  %p1732_p2 = pneg %p2173_p0  ;;  %s2183_s8 = int_to_ptr.vmem [resolvable:$true] %s231_s8 }
  0x30   : > { %s2181_s17 = scalar_lea.hbm %s2766_s2, %s1406_s25  ;;  %s1735_s27 = scalar_lea.hbm %s2766_s2, 28672 }
  0x31   : > { %s1730_s19 = scalar_lea.hbm %s2181_s17, 2048  ;;  %p1736_p7 = scmp.lt.u32.totalorder %s2181_s17, %s2766_s2 }
  0x32   : > { %p1731_p1 = scmp.ne.s32.totalorder %s2181_s17, %s1730_s19  ;;  %p1737_p8 = scmp.lt.u32.totalorder %s1735_s27, %s1730_s19 }
  0x33   : > { %p1739_p13 = scmp.lt.u32.totalorder %s1730_s19, %s2181_s17 }
  0x34   : > { %p1733_p3 = pnand %p1732_p2, %p1731_p1  ;;  %p1738_p9 = por %p1737_p8, %p1736_p7 }
  0x36   : > { %p1734_p5 = pneg %p1733_p3  ;;  %p1740_p6 = por %p1739_p13, %p1738_p9 }
  0x38   : > { %p1741_p4 = pnand %p1740_p6, %p1734_p5 }
  0x3a   : > { %1744 = shalt.err (!%p1741_p4)
}
  0x3b   : > { %s1745_s20 = scalar_lea.vmem %s2183_s8, 2048  ;;  %s2013_s22 = smov [#allocation8]  }
  0x3c   : > { %p1746_p1 = scmp.ne.s32.totalorder %s2183_s8, %s1745_s20  ;;  %s1750_s23 = sshll.u32 %s2013_s22, 4  ;;  %s1751_s23 = int_to_ptr.vmem [resolvable:$false] %s1750_s23 }
  0x3d   : > { %s1752_s11 = scalar_lea.vmem %s1751_s23, 4096  ;;  %p1753_p11 = scmp.lt.s32.totalorder %s2183_s8, %s1751_s23 }
  0x3e   : > { %p1748_p3 = pnand %p1746_p1, %p1732_p2  ;;  %p1754_p7 = scmp.lt.s32.totalorder %s1752_s11, %s1745_s20 }
  0x40   : > { %p1749_p12 = pneg %p1748_p3  ;;  %p1755_p8 = por %p1754_p7, %p1753_p11 }
  0x42   : > { %p1756_p13 = pnand %p1755_p8, %p1749_p12 }
  0x44   : > { %1759 = shalt.err (!%p1756_p13)
}
  0x45   : > { %s2738_s12 = smov 128   ;;  %s2739_s19 = smov 8  }
  0x46   : > { %1476 = dma.hbm_to_vmem [thread:$0]  (!%p2173_p0), %s2181_s17, 2048, %s2183_s8, %s2185_s5, %s2738_s12, %s2738_s12, %s2739_s19  }
  0x47   : > { %p1344_p4 = scmp.ge.s32.totalorder %s2010_s15, 1  ;;  %p287_p6 = scmp.lt.s32.totalorder %s2010_s15, 29 }
  0x48   : > { %s1330_s26 = sshll.u32 %s2167_s21, 6  ;;  %s1405_s27 = sshll.u32 %s2006_s14, 10 }
  0x49   : > { %p2218_p11 = pnand %p1344_p4, %p287_p6  ;;  %s2768_s1 = sld [smem:[#allocation35_spill]] }
  0x4a   : > { %s203_s11 = scalar_lea.vmem [#allocation5], %s1330_s26  ;;  %s200_s8 = scalar_lea.sflag [#allocation6], %s2167_s21 }
  0x4b   : > { %s2767_s25 = scalar_select %p2218_p11, 1, 0 }
  0x4c   : > { %s210_s2 = sshll.u32 %s203_s11, 4  ;;  %s2229_s2 = int_to_ptr.vmem [resolvable:$true] %s210_s2 }
  0x4f   : > { %s2227_s23 = scalar_lea.hbm %s2768_s1, %s1405_s27  ;;  %s1765_s27 = scalar_lea.hbm %s2768_s1, 14336 }
  0x50   : > { %s1760_s17 = scalar_lea.hbm %s2227_s23, 1024  ;;  %p1766_p1 = scmp.lt.u32.totalorder %s2227_s23, %s2768_s1 }
  0x51   : > { %p1761_p12 = scmp.ne.s32.totalorder %s2227_s23, %s1760_s17  ;;  %p1767_p3 = scmp.lt.u32.totalorder %s1765_s27, %s1760_s17 }
  0x52   : > { %p1769_p8 = scmp.lt.u32.totalorder %s1760_s17, %s2227_s23 }
  0x53   : > { %p1763_p5 = pnand %p1761_p12, %p1732_p2  ;;  %p1768_p7 = por %p1767_p3, %p1766_p1 }
  0x55   : > { %p1764_p9 = pneg %p1763_p5  ;;  %p1770_p13 = por %p1769_p8, %p1768_p7 }
  0x57   : > { %p1771_p4 = pnand %p1770_p13, %p1764_p9 }
  0x59   : > { %1774 = shalt.err (!%p1771_p4)
}
  0x5a   : > { %s1775_s26 = scalar_lea.vmem %s2229_s2, 1024  ;;  %s2016_s12 = smov [#allocation5]  }
  0x5b   : > { %p1776_p6 = scmp.ne.s32.totalorder %s2229_s2, %s1775_s26  ;;  %s1780_s19 = sshll.u32 %s2016_s12, 4  ;;  %s1781_s19 = int_to_ptr.vmem [resolvable:$false] %s1780_s19 }
  0x5c   : > { %s1782_s11 = scalar_lea.vmem %s1781_s19, 2048  ;;  %p1783_p10 = scmp.lt.s32.totalorder %s2229_s2, %s1781_s19 }
  0x5d   : > { %p1778_p12 = pnand %p1776_p6, %p1732_p2  ;;  %p1784_p1 = scmp.lt.s32.totalorder %s1782_s11, %s1775_s26 }
  0x5f   : > { %p1779_p5 = pneg %p1778_p12  ;;  %p1785_p3 = por %p1784_p1, %p1783_p10 }
  0x61   : > { %p1786_p7 = pnand %p1785_p3, %p1779_p5 }
  0x63   : > { %1789 = shalt.err (!%p1786_p7)
}
  0x64   : > { %s2741_s17 = smov 64   ;;  %s2742_s27 = smov 4  }
  0x65   : > { %1473 = dma.hbm_to_vmem [thread:$0]  (!%p2173_p0), %s2227_s23, 1024, %s2229_s2, %s200_s8, %s2741_s17, %s2741_s17, %s2742_s27  }
  0x66   : > { %s50_s20 = sadd.s32 1, %s1990_s10  ;;  %s40_s22 = sadd.s32 1, %s2002_s13 }
  0x67   : > { %p41_p10 = scmp.ge.s32.totalorder %s40_s22, 2  ;;  %s43_s26 = sadd.s32 1, %s2006_s14 }
  0x68   : > { %s99_s12 = sld [smem:[#allocation4 + %s2006_s14]]  ;;  %p113_p2 = scmp.ne.s32.totalorder %s1978_s7, %s1974_s0 }
  0x69   : > { %s2828_s22 = smov (%p41_p10, %s40_s22), 0  ;;  %s2830_s26 = smov (!%p41_p10, %s43_s26), %s2006_s14 }
  0x6a   : > { %2769 = sst [smem:[#allocation31_spill]] %s2828_s22  ;;  %s2271_s24 = ssub.s32 %s2002_s13, %s2828_s22 }
  0x6b   : > { %s106_s19 = sadd.s32 1, %s1978_s7  ;;  %p45_p0 = scmp.ge.s32.totalorder %s2830_s26, 14 }
  0x6c   : > { %p119_p9 = scmp.ne.s32.totalorder %s1974_s0, %s1970_s6  ;;  %p2770_p8 = scmp.eq.s32.totalorder %s2010_s15, 0 }
  0x6d   : > { %s243_s21 = sand.u32 1, %s1978_s7   ;;  %s2832_s26 = smov (%p45_p0, %s2830_s26), 0 }
  0x6e   : > { %p2278_p13 = por %p113_p2, %p2770_p8  ;;  %2772 = sst [smem:[#allocation32_spill]] %s2832_s26 }
  0x6f   : > { %p2773_p4 = scmp.eq.s32.totalorder %s2139_s16, 0  ;;  %s1336_s6 = sshll.u32 %s243_s21, 7 }
  0x70   : > { %s47_s8 = ssub.s32 %s2006_s14, %s2832_s26  ;;  %s100_s11 = sld [smem:[#allocation4 + %s2832_s26]] }
  0x71   : > { %p2287_p6 = por %p119_p9, %p2773_p4  ;;  %p48_p12 = scmp.eq.s32.totalorder %s47_s8, 0 }
  0x72   : > { %s1458_s17 = scalar_select %p2278_p13, [#allocation4], [#allocation14] }
  0x73   : > { %s2774_s23 = scalar_select %p2287_p6, 1, 0 }
  0x74   : > { %s2297_s27 = scalar_select %p48_p12, %s1990_s10, %s50_s20  }
  0x75   : > { %2775 = sst [smem:[#allocation33_spill]] %s2774_s23  ;;  %p2777_p5 = scmp.lt.s32.totalorder %s2010_s15, 28 }
  0x76   : > { %2776 = sst [smem:[#allocation34_spill]] %s2297_s27  ;;  %s101_s22 = ssub.s32 %s99_s12, %s100_s11 }
  0x77   : > { %s1459_s1 = scalar_select %p2278_p13, %s2006_s14, 0 }
  0x78   : > { %s2834_s17 = smov (!%p2777_p5, %s1458_s17), [#allocation16]  ;;  %s1337_s21 = sshll.u32 %s2002_s13, 5 }
  0x79   : > { %s103_s23 = sor.u32 %s2271_s24, %s101_s22  ;;  %s245_s0 = scalar_lea.vmem [#allocation10], %s1336_s6 }
  0x7a   : > { %s255_s8 = sshll.u32 %s245_s0, 4  ;;  %p104_p1 = scmp.eq.s32.totalorder %s103_s23, 0  ;;  %s2325_s8 = int_to_ptr.vmem [resolvable:$true] %s255_s8 }
  0x7b   : > { %p2778_p3 = pmov %p2777_p5  ;;  %s2320_s11 = sld [smem:[#allocation4 + %s2006_s14]] }
  0x7c   : > { %s2317_s27 = scalar_select %p104_p1, %s1978_s7, %s106_s19  }
  0x7d   : > { %p2310_p7 = pnand %p2778_p3, %p2278_p13  ;;  %p2780_p10 = pmov %p2778_p3 }
  0x7e   : > { %s2323_s22 = sld [smem:[#allocation4 + %s2832_s26]]  ;;  %p143_p2 = scmp.ne.s32.totalorder %s1966_s30, %s1962_s29 }
  0x7f   : > { %s2836_s1 = smov (!%p2780_p10, %s1459_s1), 0  ;;  %p149_p0 = scmp.ne.s32.totalorder %s1962_s29, %s1958_s28 }
  0x80   : > { %s246_s12 = sld [smem:[%s2834_s17 + %s2836_s1]]  ;;  %p2781_p9 = pmov %p2770_p8 }
  0x81   : > { %p2783_p13 = pmov %p2773_p4  ;;  %s2785_s3 = sld [smem:[#allocation37_spill]] }
  0x82   : > { %p2333_p8 = por %p143_p2, %p2781_p9  ;;  %s265_s28 = sand.u32 1, %s1966_s30  }
  0x83   : > { %p2339_p4 = por %p149_p0, %p2783_p13  ;;  %p1792_p5 = pneg %p2310_p7 }
  0x85   : > { %s2784_s1 = scalar_select %p2339_p4, 1, 0 }
  0x86   : > { %s1338_s0 = sshll.u32 %s246_s12, 6 }
  0x87   : > { %s252_s2 = sadd.s32 %s1338_s0, %s1337_s21 }
  0x88   : > { %s1339_s19 = sshll.u32 %s252_s2, 6  ;;  %s1795_s2 = scalar_lea.hbm %s2785_s3, 24576 }
  0x89   : > { %s2346_s26 = scalar_lea.hbm %s2785_s3, %s1339_s19 }
  0x8a   : > { %s1790_s21 = scalar_lea.hbm %s2346_s26, 2048  ;;  %p1796_p10 = scmp.lt.u32.totalorder %s2346_s26, %s2785_s3 }
  0x8b   : > { %p1791_p12 = scmp.ne.s32.totalorder %s2346_s26, %s1790_s21  ;;  %p1797_p2 = scmp.lt.u32.totalorder %s1795_s2, %s1790_s21 }
  0x8c   : > { %p1799_p9 = scmp.lt.u32.totalorder %s1790_s21, %s2346_s26 }
  0x8d   : > { %p1793_p1 = pnand %p1792_p5, %p1791_p12  ;;  %p1798_p0 = por %p1797_p2, %p1796_p10 }
  0x8f   : > { %p1794_p3 = pneg %p1793_p1  ;;  %p1800_p13 = por %p1799_p9, %p1798_p0 }
  0x91   : > { %p1801_p4 = pnand %p1800_p13, %p1794_p3 }
  0x93   : > { %1804 = shalt.err (!%p1801_p4)
}
  0x94   : > { %s1805_s6 = scalar_lea.vmem %s2325_s8, 2048  ;;  %s2019_s12 = smov [#allocation10]  }
  0x95   : > { %p1806_p12 = scmp.ne.s32.totalorder %s2325_s8, %s1805_s6  ;;  %s1810_s0 = sshll.u32 %s2019_s12, 4  ;;  %s1811_s0 = int_to_ptr.vmem [resolvable:$false] %s1810_s0 }
  0x96   : > { %s1812_s17 = scalar_lea.vmem %s1811_s0, 4096  ;;  %p1813_p11 = scmp.lt.s32.totalorder %s2325_s8, %s1811_s0 }
  0x97   : > { %p1808_p1 = pnand %p1806_p12, %p1792_p5  ;;  %p1814_p10 = scmp.lt.s32.totalorder %s1812_s17, %s1805_s6 }
  0x99   : > { %p1809_p6 = pneg %p1808_p1  ;;  %p1815_p2 = por %p1814_p10, %p1813_p11 }
  0x9b   : > { %p1816_p0 = pnand %p1815_p2, %p1809_p6 }
  0x9d   : > { %1819 = shalt.err (!%p1816_p0)
}
  0x9e   : > { %s2786_s21 = smov 8   ;;  %s2787_s2 = smov 128  }
  0x9f   : > { %1481 = dma.hbm_to_vmem [thread:$0]  (!%p2310_p7), %s2346_s26, 2048, %s2325_s8, %s2185_s5, %s2787_s2, %s2787_s2, %s2786_s21  }
  0xa0   : > { %s131_s20 = ssub.s32 %s2320_s11, %s2323_s22  ;;  %s136_s6 = sadd.s32 1, %s1966_s30 }
  0xa1   : > { %s133_s19 = sor.u32 %s131_s20, %s2271_s24  ;;  %s1340_s12 = sshll.u32 %s265_s28, 6 }
  0xa2   : > { %p134_p11 = scmp.eq.s32.totalorder %s133_s19, 0  ;;  %p2788_p6 = scmp.lt.s32.totalorder %s2010_s15, 28 }
  0xa3   : > { %s1461_s0 = scalar_select %p2333_p8, [#allocation4], [#allocation15] }
  0xa4   : > { %s2387_s17 = scalar_select %p134_p11, %s1966_s30, %s136_s6  }
  0xa5   : > { %s1462_s3 = scalar_select %p2333_p8, %s2006_s14, 0 }
  0xa6   : > { %s2838_s0 = smov (!%p2788_p6, %s1461_s0), [#allocation17]  ;;  %p2789_p4 = pmov %p2788_p6 }
  0xa7   : > { %s1341_s26 = sshll.u32 %s2002_s13, 4  ;;  %s269_s24 = scalar_lea.vmem [#allocation11], %s1340_s12 }
  0xa8   : > { %s2840_s3 = smov (!%p2789_p4, %s1462_s3), 0  ;;  %p2790_p7 = pmov %p2789_p4 }
  0xa9   : > { %s270_s10 = sld [smem:[%s2838_s0 + %s2840_s3]]  ;;  %s279_s8 = sshll.u32 %s269_s24, 4  ;;  %s2405_s8 = int_to_ptr.vmem [resolvable:$true] %s279_s8 }
  0xaa   : > { %p2400_p5 = pnand %p2790_p7, %p2333_p8  ;;  %s2414_s23 = scalar_lea.sflag [#allocation12], %s265_s28 }
  0xab   : > { %s1825_s12 = scalar_lea.hbm %s2727_s4, 12288 }
  0xac   : > { %p1822_p3 = pneg %p2400_p5 }
  0xaf   : > { %s1342_s11 = sshll.u32 %s270_s10, 5 }
  0xb0   : > { %s276_s22 = sadd.s32 %s1342_s11, %s1341_s26 }
  0xb1   : > { %s1343_s21 = sshll.u32 %s276_s22, 6 }
  0xb2   : > { %s2410_s3 = scalar_lea.hbm %s2727_s4, %s1343_s21 }
  0xb3   : > { %s1820_s19 = scalar_lea.hbm %s2410_s3, 1024  ;;  %p1826_p12 = scmp.lt.u32.totalorder %s2410_s3, %s2727_s4 }
  0xb4   : > { %p1821_p8 = scmp.ne.s32.totalorder %s2410_s3, %s1820_s19  ;;  %p1827_p1 = scmp.lt.u32.totalorder %s1825_s12, %s1820_s19 }
  0xb5   : > { %p1829_p2 = scmp.lt.u32.totalorder %s1820_s19, %s2410_s3 }
  0xb6   : > { %p1823_p9 = pnand %p1822_p3, %p1821_p8  ;;  %p1828_p10 = por %p1827_p1, %p1826_p12 }
  0xb8   : > { %p1824_p13 = pneg %p1823_p9  ;;  %p1830_p0 = por %p1829_p2, %p1828_p10 }
  0xba   : > { %p1831_p11 = pnand %p1830_p0, %p1824_p13 }
  0xbc   : > { %1834 = shalt.err (!%p1831_p11)
}
  0xbd   : > { %s1835_s28 = scalar_lea.vmem %s2405_s8, 1024  ;;  %s2020_s24 = smov [#allocation11]  }
  0xbe   : > { %p1836_p6 = scmp.ne.s32.totalorder %s2405_s8, %s1835_s28  ;;  %s1840_s11 = sshll.u32 %s2020_s24, 4  ;;  %s1841_s11 = int_to_ptr.vmem [resolvable:$false] %s1840_s11 }
  0xbf   : > { %s1842_s22 = scalar_lea.vmem %s1841_s11, 2048  ;;  %p1843_p8 = scmp.lt.s32.totalorder %s2405_s8, %s1841_s11 }
  0xc0   : > { %p1838_p4 = pnand %p1836_p6, %p1822_p3  ;;  %p1844_p9 = scmp.lt.s32.totalorder %s1842_s22, %s1835_s28 }
  0xc2   : > { %p1839_p7 = pneg %p1838_p4  ;;  %p1845_p12 = por %p1844_p9, %p1843_p8 }
  0xc4   : > { %p1846_p1 = pnand %p1845_p12, %p1839_p7 }
  0xc6   : > { %1849 = shalt.err (!%p1846_p1)
}
  0xc7   : > { %s2792_s21 = smov 4   ;;  %s2793_s2 = smov 64  }
  0xc8   : > { %1486 = dma.hbm_to_vmem [thread:$0]  (!%p2400_p5), %s2410_s3, 1024, %s2405_s8, %s2414_s23, %s2793_s2, %s2793_s2, %s2792_s21  }
  0xc9   : > { %p2794_p3 = scmp.ne.s32.totalorder %s2767_s25, 0 }
  0xca   : > { %s2448_s20 = sand.u32 (!%p2794_p3), 1, %s1986_s9   ;;  %p2795_p13 = scmp.ne.s32.totalorder (!%p2794_p3), %s2760_s18, 0 }
  0xcb   : > { %291 = sbr.rel (%p2794_p3) target bundleno = 836 (0x344), region = 36  ;;  %s1345_s19 = sshll.u32 (!%p2794_p3), %s2448_s20, 6 }
  0xcc   : > { %s294_s10 = scalar_lea.sflag (!%p2794_p3), [#allocation6], %s2448_s20  ;;  %s2452_s6 = scalar_lea.vmem (!%p2794_p3), [#allocation5], %s1345_s19 }
  0xd2   : > { %1937 = dma.done.wait (%p2795_p13), %s294_s10, 1024  }
  0xd3   : > { %1939 = vsyncadd (%p2795_p13), %s294_s10, 4294966272  ;;  %s302_s25 = sand.u32 1, %s2139_s16   ;;  %s1346_s5 = sshll.u32 %s2448_s20, 7 }
  0xd4   : > { %s303_s8 = scalar_lea.sflag [#allocation9], %s302_s25  ;;  %s2460_s3 = scalar_lea.vmem [#allocation8], %s1346_s5 }
  0xd5   : > { %1941 = dma.done.wait (%p2795_p13), %s303_s8, 2048  }
  0xd6   : > { %1943 = vsyncadd (%p2795_p13), %s303_s8, 4294965248  ;;  %s2796_s23 = sld [smem:[#allocation24_spill]]  ;;  %s2797_s12 = sld [smem:[#allocation33_spill]] }
  0xdc   : > { %s313_s0 = sand.u32 1, %s2796_s23   ;;  %p2798_p5 = scmp.ne.s32.totalorder %s2797_s12, 0 }
  0xdd   : > { %s1347_s26 = sshll.u32 %s313_s0, 7 }
  0xde   : > { %s2467_s28 = scalar_lea.vmem [#allocation10], %s1347_s26 }
  0xdf   : > { %1945 = dma.done.wait (%p2798_p5), %s303_s8, 2048  }
  0xe0   : > { %1947 = vsyncadd (%p2798_p5), %s303_s8, 4294965248  ;;  %s320_s16 = sand.u32 1, %s1962_s29   ;;  %p2799_p10 = scmp.ne.s32.totalorder %s2784_s1, 0 }
  0xe1   : > { %s1348_s24 = sshll.u32 %s320_s16, 6  ;;  %s321_s11 = scalar_lea.sflag [#allocation12], %s320_s16 }
  0xe2   : > { %s2474_s22 = scalar_lea.vmem [#allocation11], %s1348_s24 }
  0xe3   : > { %1949 = dma.done.wait (%p2799_p10), %s321_s11, 1024  }
  0xe4   : > { %1951 = vsyncadd (%p2799_p10), %s321_s11, 4294966272  ;;  %s2480_s18 = scalar_lea.vmem [#allocation13], %s1346_s5  ;;  %s2800_s21 = sld [smem:[#allocation27_spill]] }
  0xea   : > { %p1350_p2 = scmp.ne.s32.totalorder %s2800_s21, 0 }
  0xeb   : > { %v2021_v0 = vmov (!%p1350_p2), 0.0  }
  0xec   : > { %373 = sbr.rel (%p1350_p2) target bundleno = 244 (0xf4), region = 56  ;;  %374 = vst [vmem:[#allocation2] sm:$0xff] (!%p1350_p2), %v2021_v0  ;;  %375 = vst [vmem:[#allocation2 + $0x8] sm:$0xff] (!%p1350_p2), %v2021_v0 }
  0xed   : > { %376 = vst [vmem:[#allocation2 + $0x10] sm:$0xff] (!%p1350_p2), %v2021_v0  ;;  %377 = vst [vmem:[#allocation2 + $0x18] sm:$0xff] (!%p1350_p2), %v2021_v0 }
  0xee   : > { %378 = vst [vmem:[#allocation2 + $0x20] sm:$0xff] (!%p1350_p2), %v2021_v0  ;;  %379 = vst [vmem:[#allocation2 + $0x28] sm:$0xff] (!%p1350_p2), %v2021_v0 }
  0xef   : > { %380 = vst [vmem:[#allocation2 + $0x30] sm:$0xff] (!%p1350_p2), %v2021_v0  ;;  %381 = vst [vmem:[#allocation2 + $0x38] sm:$0xff] (!%p1350_p2), %v2021_v0 }
  0xf0   : > { %382 = vst [vmem:[#allocation2 + $0x40] sm:$0xff] (!%p1350_p2), %v2021_v0  ;;  %383 = vst [vmem:[#allocation2 + $0x48] sm:$0xff] (!%p1350_p2), %v2021_v0 }
  0xf1   : > { %384 = vst [vmem:[#allocation2 + $0x50] sm:$0xff] (!%p1350_p2), %v2021_v0  ;;  %385 = vst [vmem:[#allocation2 + $0x58] sm:$0xff] (!%p1350_p2), %v2021_v0 }
  0xf2   : > { %386 = vst [vmem:[#allocation2 + $0x60] sm:$0xff] (!%p1350_p2), %v2021_v0  ;;  %387 = vst [vmem:[#allocation2 + $0x68] sm:$0xff] (!%p1350_p2), %v2021_v0 }
  0xf3   : > { %388 = vst [vmem:[#allocation2 + $0x70] sm:$0xff] %v2021_v0  ;;  %389 = vst [vmem:[#allocation2 + $0x78] sm:$0xff] %v2021_v0 }
  0xf4 PF: > { %v1616_v1 = vld [vmem:[%s2467_s28 + $0x4] ss:$8 sps:$4 sm:$0xff]   ;;  %v1618_v2 = vld [vmem:[%s2467_s28] ss:$8 sps:$4 sm:$0xff]   ;;  %v2022_v3 = vmov 0   ;;  %v793_v15 = vld [vmem:[%s2460_s3 + $0x10] sm:$0xff] }
  0xf5   : > { %582 = vmatprep.mubr.bf16.mxu0 %v2022_v3  ;;  %1614 = vset.pattern.permute.xlu0 %v2022_v3  ;;  %v1619_v4 = vld [vmem:[%s2467_s28 + $0x14] ss:$8 sps:$4 sm:$0xff]   ;;  %v1621_v5 = vld [vmem:[%s2467_s28 + $0x10] ss:$8 sps:$4 sm:$0xff]   ;;  %v1622_v6 = vld [vmem:[%s2467_s28 + $0x24] ss:$8 sps:$4 sm:$0xff]  }
  0xf6   : > { %550 = vmatprep.subr.bf16.mxu0 %v1616_v1  ;;  %1615 = vset.pattern.permute.xlu1 %v2022_v3  ;;  %v1624_v7 = vld [vmem:[%s2467_s28 + $0x20] ss:$8 sps:$4 sm:$0xff]   ;;  %v1625_v8 = vld [vmem:[%s2467_s28 + $0x34] ss:$8 sps:$4 sm:$0xff]   ;;  %v1627_v9 = vld [vmem:[%s2467_s28 + $0x30] ss:$8 sps:$4 sm:$0xff]  }
  0xf7   : > { %551 = vmatpush1.bf16.msra.mxu0 %v1618_v2  ;;  %v1628_v10 = vld [vmem:[%s2467_s28 + $0x44] ss:$8 sps:$4 sm:$0xff]   ;;  %v1630_v11 = vld [vmem:[%s2467_s28 + $0x40] ss:$8 sps:$4 sm:$0xff]   ;;  %v1631_v12 = vld [vmem:[%s2467_s28 + $0x54] ss:$8 sps:$4 sm:$0xff]   ;;  %819 = vperm.xlu1 %1615, %v793_v15  }
  0xf8   : > { %552 = vmatprep.subr.bf16.mxu0 %v1619_v4  ;;  %v791_v13 = vld [vmem:[%s2460_s3] sm:$0xff]  ;;  %v1633_v14 = vld [vmem:[%s2467_s28 + $0x50] ss:$8 sps:$4 sm:$0xff]   ;;  %v792_v17 = vld [vmem:[%s2460_s3 + $0x8] sm:$0xff]  ;;  %s2801_s1 = sld [smem:[#allocation27_spill]] }
  0xf9   : > { %809 = vperm.xlu0 %1614, %v791_v13   ;;  %v1634_v16 = vld [vmem:[%s2467_s28 + $0x64] ss:$8 sps:$4 sm:$0xff]   ;;  %v794_v18 = vld [vmem:[%s2460_s3 + $0x18] sm:$0xff]  ;;  %v1636_v19 = vld [vmem:[%s2467_s28 + $0x60] ss:$8 sps:$4 sm:$0xff]  }
  0xfa   : > { %v1637_v20 = vld [vmem:[%s2467_s28 + $0x74] ss:$8 sps:$4 sm:$0xff]   ;;  %v795_v21 = vld [vmem:[%s2460_s3 + $0x20] sm:$0xff]  ;;  %v796_v22 = vld [vmem:[%s2460_s3 + $0x28] sm:$0xff] }
  0xfb   : > { %553 = vmatpush1.bf16.msra.mxu0 %v1621_v5  ;;  %824 = vperm.xlu1 %1615, %v794_v18   ;;  %v1639_v23 = vld [vmem:[%s2467_s28 + $0x70] ss:$8 sps:$4 sm:$0xff]   ;;  %v1640_v26 = vld [vmem:[%s2452_s6] sm:$0xff]   ;;  %v800_v28 = vld [vmem:[%s2460_s3 + $0x48] sm:$0xff] }
  0xfc   : > { %554 = vmatprep.subr.bf16.mxu0 %v1622_v6  ;;  %v797_v24 = vld [vmem:[%s2460_s3 + $0x30] sm:$0xff]  ;;  %v798_v25 = vld [vmem:[%s2460_s3 + $0x38] sm:$0xff]  ;;  %v799_v27 = vld [vmem:[%s2460_s3 + $0x40] sm:$0xff] }
  0xfd   : > { %814 = vperm.xlu0 %1614, %v792_v17   ;;  %v801_v29 = vld [vmem:[%s2460_s3 + $0x50] sm:$0xff]  ;;  %v802_v30 = vld [vmem:[%s2460_s3 + $0x58] sm:$0xff]  ;;  %v1641_v31 = vld [vmem:[%s2452_s6 + $0x8] sm:$0xff]  }
  0xfe   : > { %v803_v32 = vld [vmem:[%s2460_s3 + $0x60] sm:$0xff]  ;;  %v804_v33 = vld [vmem:[%s2460_s3 + $0x68] sm:$0xff]  ;;  %v805_v34 = vld [vmem:[%s2460_s3 + $0x70] sm:$0xff]  ;;  %p1399_p0 = scmp.ne.s32.totalorder %s2801_s1, 1 }
  0xff   : > { %555 = vmatpush1.bf16.msra.mxu0 %v1624_v7  ;;  %834 = vperm.xlu1 %1615, %v796_v22   ;;  %v806_v35 = vld [vmem:[%s2460_s3 + $0x78] sm:$0xff]  ;;  %v1642_v36 = vld [vmem:[%s2452_s6 + $0x10] sm:$0xff]   ;;  %v1644_v38 = vld [vmem:[%s2452_s6 + $0x20] sm:$0xff]  }
 0x100   : > { %556 = vmatprep.subr.bf16.mxu0 %v1625_v8  ;;  %v1643_v37 = vld [vmem:[%s2452_s6 + $0x18] sm:$0xff]   ;;  %v1645_v39 = vld [vmem:[%s2452_s6 + $0x28] sm:$0xff]   ;;  %v1646_v40 = vld [vmem:[%s2452_s6 + $0x30] sm:$0xff]  }
 0x101   : > { %829 = vperm.xlu0 %1614, %v795_v21   ;;  %v1647_v41 = vld [vmem:[%s2452_s6 + $0x38] sm:$0xff]   ;;  %v1648_v42 = vld [vmem:[%s2474_s22] sm:$0xff]   ;;  %v1649_v43 = vld [vmem:[%s2474_s22 + $0x8] sm:$0xff]  }
 0x102   : > { %1424 = vmatprep.subr.bf16.mxu1 %v1648_v42  ;;  %v1650_v44 = vld [vmem:[%s2474_s22 + $0x10] sm:$0xff]   ;;  %v1651_v45 = vld [vmem:[%s2474_s22 + $0x18] sm:$0xff]   ;;  %v1652_v46 = vld [vmem:[%s2474_s22 + $0x20] sm:$0xff]  }
 0x103   : > { %557 = vmatpush1.bf16.msra.mxu0 %v1627_v9  ;;  %844 = vperm.xlu1 %1615, %v798_v25   ;;  %v1653_v47 = vld [vmem:[%s2474_s22 + $0x28] sm:$0xff]   ;;  %v1654_v48 = vld [vmem:[%s2474_s22 + $0x30] sm:$0xff]   ;;  %v1655_v49 = vld [vmem:[%s2474_s22 + $0x38] sm:$0xff]  }
 0x104   : > { %558 = vmatprep.subr.bf16.mxu0 %v1628_v10  ;;  %1425 = vmatpush3.bf16.msra.mxu1 %v1648_v42 }
 0x105   : > { %839 = vperm.xlu0 %1614, %v797_v24   ;;  %1426 = vmatprep.subr.bf16.mxu1 %v1649_v43 }
 0x107   : > { %559 = vmatpush1.bf16.msra.mxu0 %v1630_v11  ;;  %854 = vperm.xlu1 %1615, %v800_v28  }
 0x108   : > { %560 = vmatprep.subr.bf16.mxu0 %v1631_v12  ;;  %1427 = vmatpush3.bf16.msra.mxu1 %v1649_v43 }
 0x109   : > { %849 = vperm.xlu0 %1614, %v799_v27   ;;  %1428 = vmatprep.subr.bf16.mxu1 %v1650_v44 }
 0x10b   : > { %561 = vmatpush1.bf16.msra.mxu0 %v1633_v14  ;;  %864 = vperm.xlu1 %1615, %v802_v30  }
 0x10c   : > { %562 = vmatprep.subr.bf16.mxu0 %v1634_v16  ;;  %1429 = vmatpush3.bf16.msra.mxu1 %v1650_v44 }
 0x10d   : > { %859 = vperm.xlu0 %1614, %v801_v29   ;;  %1430 = vmatprep.subr.bf16.mxu1 %v1651_v45 }
 0x10f   : > { %563 = vmatpush1.bf16.msra.mxu0 %v1636_v19  ;;  %874 = vperm.xlu1 %1615, %v804_v33  }
 0x110   : > { %564 = vmatprep.subr.bf16.mxu0 %v1637_v20  ;;  %1431 = vmatpush3.bf16.msra.mxu1 %v1651_v45 }
 0x111   : > { %869 = vperm.xlu0 %1614, %v803_v32   ;;  %1432 = vmatprep.subr.bf16.mxu1 %v1652_v46 }
 0x113   : > { %565 = vmatpush1.bf16.msra.mxu0 %v1639_v23  ;;  %884 = vperm.xlu1 %1615, %v806_v35  }
 0x114   : > { %1433 = vmatpush3.bf16.msra.mxu1 %v1652_v46 }
 0x115   : > { %879 = vperm.xlu0 %1614, %v805_v34   ;;  %1434 = vmatprep.subr.bf16.mxu1 %v1653_v47 }
 0x116   : > { %583 = vmatmul.mubr.bf16.vlgmr.msra.gmra.mrb[0].mxu0 %v1640_v26 }
 0x117   : > { %592 = vmatprep.mubr.bf16.mxu0 %v2022_v3 }
 0x118   : > { %1435 = vmatpush3.bf16.msra.mxu1 %v1653_v47 }
 0x119   : > { %1436 = vmatprep.subr.bf16.mxu1 %v1654_v48 }
 0x11c   : > { %1437 = vmatpush3.bf16.msra.mxu1 %v1654_v48 }
 0x11d   : > { %1438 = vmatprep.subr.bf16.mxu1 %v1655_v49 }
 0x11e   : > { %593 = vmatmul.mubr.bf16.gmra.mrb[4].mxu0 %v1641_v31 }
 0x11f   : > { %602 = vmatprep.mubr.bf16.mxu0 %v2022_v3 }
 0x120   : > { %1439 = vmatpush3.bf16.msra.mxu1 %v1655_v49 }
 0x126   : > { %603 = vmatmul.mubr.bf16.gmra.mrb[8].mxu0 %v1642_v36 }
 0x127   : > { %612 = vmatprep.mubr.bf16.mxu0 %v2022_v3 }
 0x12e   : > { %613 = vmatmul.mubr.bf16.gmra.mrb[12].mxu0 %v1643_v37 }
 0x12f   : > { %622 = vmatprep.mubr.bf16.mxu0 %v2022_v3 }
 0x136   : > { %623 = vmatmul.mubr.bf16.gmra.mrb[16].mxu0 %v1644_v38 }
 0x137   : > { %632 = vmatprep.mubr.bf16.mxu0 %v2022_v3 }
 0x13e   : > { %633 = vmatmul.mubr.bf16.gmra.mrb[20].mxu0 %v1645_v39 }
 0x13f   : > { %642 = vmatprep.mubr.bf16.mxu0 %v2022_v3 }
 0x146   : > { %643 = vmatmul.mubr.bf16.gmra.mrb[24].mxu0 %v1646_v40 }
 0x147   : > { %652 = vmatprep.mubr.bf16.mxu0 %v2022_v3 }
 0x14e   : > { %653 = vmatmul.mubr.bf16.gmra.mrb[28].mxu0 %v1647_v41 }
 0x176   : > { %v820_v36 = vpop.permute.xlu1 %819 }
 0x178   : > { %v810_v13 = vpop.permute.xlu0 %809 }
 0x17c   : > { %v815_v26 = vpop.permute.xlu0 %814 }
 0x1e9   : > { %v584_v50 = vpop.f32.mrb[0].mxu0 }
 0x1ea   : > { %v1375_v51 = vmul.f32 -1.442695, %v584_v50  ;;  %v586_v52 = vpop.f32.mrb[1].mxu0 }
 0x1eb   : > { %v588_v53 = vpop.f32.mrb[2].mxu0 }
 0x1ec   : > { %1656 = vpow2.f32 %v1375_v51  ;;  %v1376_v54 = vmul.f32 -1.442695, %v588_v53  ;;  %v590_v55 = vpop.f32.mrb[3].mxu0 }
 0x1ee   : > { %1658 = vpow2.f32 %v1376_v54 }
 0x1f1   : > { %v594_v56 = vpop.f32.mrb[4].mxu0 }
 0x1f2   : > { %v1377_v57 = vmul.f32 -1.442695, %v594_v56  ;;  %v2541_v58 = vpop.f32.mrb[5].mxu0 }
 0x1f3   : > { %v2543_v59 = vpop.f32.mrb[6].mxu0 }
 0x1f4   : > { %1660 = vpow2.f32 %v1377_v57  ;;  %v1378_v60 = vmul.f32 -1.442695, %v2543_v59  ;;  %v2546_v61 = vpop.f32.mrb[7].mxu0 }
 0x1f6   : > { %v1657_v62 = vpop.eup %1656  ;;  %1662 = vpow2.f32 %v1378_v60 }
 0x1f7   : > { %v711_v63 = vadd.f32 1.0, %v1657_v62 }
 0x1f8   : > { %v1659_v0 = vpop.eup %1658 }
 0x1f9   : > { %1664 = vrcp.f32 %v711_v63  ;;  %v712_v1 = vadd.f32 1.0, %v1659_v0  ;;  %v2548_v2 = vpop.f32.mrb[8].mxu0 }
 0x1fa   : > { %v1379_v3 = vmul.f32 -1.442695, %v2548_v2  ;;  %v2551_v4 = vpop.f32.mrb[9].mxu0 }
 0x1fb   : > { %1666 = vrcp.f32 %v712_v1  ;;  %v2553_v5 = vpop.f32.mrb[10].mxu0 }
 0x1fc   : > { %1668 = vpow2.f32 %v1379_v3  ;;  %v1380_v6 = vmul.f32 -1.442695, %v2553_v5  ;;  %v2556_v7 = vpop.f32.mrb[11].mxu0 }
 0x1fe   : > { %v1661_v8 = vpop.eup %1660  ;;  %1670 = vpow2.f32 %v1380_v6 }
 0x1ff   : > { %v713_v9 = vadd.f32 1.0, %v1661_v8 }
 0x200   : > { %v1663_v10 = vpop.eup %1662 }
 0x201   : > { %1672 = vrcp.f32 %v713_v9  ;;  %v714_v11 = vadd.f32 1.0, %v1663_v10  ;;  %v2558_v12 = vpop.f32.mrb[12].mxu0  ;;  %v830_v9 = vpop.permute.xlu0 %829 }
 0x202   : > { %v1381_v14 = vmul.f32 -1.442695, %v2558_v12  ;;  %v2561_v15 = vpop.f32.mrb[13].mxu0 }
 0x203   : > { %v1665_v16 = vpop.eup %1664  ;;  %1674 = vrcp.f32 %v714_v11  ;;  %v2563_v17 = vpop.f32.mrb[14].mxu0 }
 0x204   : > { %v759_v18 = vmul.f32 %v1665_v16, %v584_v50  ;;  %1676 = vpow2.f32 %v1381_v14  ;;  %v1382_v19 = vmul.f32 -1.442695, %v2563_v17  ;;  %v2566_v20 = vpop.f32.mrb[15].mxu0  ;;  %v825_v50 = vpop.permute.xlu1 %824 }
 0x205   : > { %v1667_v21 = vpop.eup %1666 }
 0x206   : > { %v1669_v22 = vpop.eup %1668  ;;  %v775_v23 = vmul.f32 %v759_v18, %v586_v52  ;;  %v760_v24 = vmul.f32 %v1667_v21, %v588_v53  ;;  %1678 = vpow2.f32 %v1382_v19 }
 0x207   : > { %v715_v25 = vadd.f32 1.0, %v1669_v22 }
 0x208   : > { %v1671_v27 = vpop.eup %1670  ;;  %v776_v28 = vmul.f32 %v760_v24, %v590_v55  ;;  %v887_v31 = vmul.f32 %v810_v13, %v775_v23  ;;  %v835_v10 = vpop.permute.xlu1 %834 }
 0x209   : > { %1680 = vrcp.f32 %v715_v25  ;;  %v716_v29 = vadd.f32 1.0, %v1671_v27  ;;  %v2568_v30 = vpop.f32.mrb[16].mxu0 }
 0x20a   : > { %v888_v32 = vmul.f32 %v815_v26, %v776_v28  ;;  %v1383_v33 = vmul.f32 -1.442695, %v2568_v30  ;;  %v2571_v34 = vpop.f32.mrb[17].mxu0 }
 0x20b   : > { %v1673_v35 = vpop.eup %1672  ;;  %1682 = vrcp.f32 %v716_v29  ;;  %v2573_v37 = vpop.f32.mrb[18].mxu0 }
 0x20c   : > { %v761_v38 = vmul.f32 %v1673_v35, %v594_v56  ;;  %1684 = vpow2.f32 %v1383_v33  ;;  %v1384_v39 = vmul.f32 -1.442695, %v2573_v37  ;;  %v2576_v40 = vpop.f32.mrb[19].mxu0  ;;  %v919_v41 = vpack.c.bf16 %v888_v32, %v887_v31  ;;  %v840_v31 = vpop.permute.xlu0 %839 }
 0x20d   : > { %v1675_v42 = vpop.eup %1674  ;;  %v845_v32 = vpop.permute.xlu1 %844 }
 0x20e   : > { %v1677_v43 = vpop.eup %1676  ;;  %v777_v44 = vmul.f32 %v761_v38, %v2541_v58  ;;  %v762_v45 = vmul.f32 %v1675_v42, %v2543_v59  ;;  %1686 = vpow2.f32 %v1384_v39  ;;  %1440 = vmatprep.mubr.bf16.mxu1 %v919_v41 }
 0x20f   : > { %v717_v46 = vadd.f32 1.0, %v1677_v43 }
 0x210   : > { %v1679_v47 = vpop.eup %1678  ;;  %v778_v48 = vmul.f32 %v762_v45, %v2546_v61  ;;  %v889_v52 = vmul.f32 %v820_v36, %v777_v44 }
 0x211   : > { %1688 = vrcp.f32 %v717_v46  ;;  %v718_v49 = vadd.f32 1.0, %v1679_v47  ;;  %v2581_v51 = vpop.f32.mrb[20].mxu0 }
 0x212   : > { %v890_v53 = vmul.f32 %v825_v50, %v778_v48  ;;  %v1385_v54 = vmul.f32 -1.442695, %v2581_v51  ;;  %v2584_v55 = vpop.f32.mrb[21].mxu0 }
 0x213   : > { %v1681_v56 = vpop.eup %1680  ;;  %1690 = vrcp.f32 %v718_v49  ;;  %v2586_v57 = vpop.f32.mrb[22].mxu0 }
 0x214   : > { %v763_v58 = vmul.f32 %v1681_v56, %v2548_v2  ;;  %v920_v59 = vpack.c.bf16 %v890_v53, %v889_v52  ;;  %1692 = vpow2.f32 %v1385_v54  ;;  %v1386_v60 = vmul.f32 -1.442695, %v2586_v57  ;;  %v2590_v61 = vpop.f32.mrb[23].mxu0  ;;  %v850_v52 = vpop.permute.xlu0 %849 }
 0x215   : > { %v1683_v62 = vpop.eup %1682  ;;  %v855_v53 = vpop.permute.xlu1 %854 }
 0x216   : > { %v1685_v63 = vpop.eup %1684  ;;  %v779_v0 = vmul.f32 %v763_v58, %v2551_v4  ;;  %v764_v1 = vmul.f32 %v1683_v62, %v2553_v5  ;;  %1694 = vpow2.f32 %v1386_v60  ;;  %1441 = vmatmul.mubr.bf16.vlgmr.msra.gmra.mrb[0].mxu1 %v920_v59 }
 0x217   : > { %v719_v3 = vadd.f32 1.0, %v1685_v63 }
 0x218   : > { %v1687_v6 = vpop.eup %1686  ;;  %v780_v8 = vmul.f32 %v764_v1, %v2556_v7  ;;  %v891_v13 = vmul.f32 %v830_v9, %v779_v0 }
 0x219   : > { %1696 = vrcp.f32 %v719_v3  ;;  %v720_v2 = vadd.f32 1.0, %v1687_v6  ;;  %v2595_v11 = vpop.f32.mrb[24].mxu0  ;;  %v860_v3 = vpop.permute.xlu0 %859 }
 0x21a   : > { %v892_v14 = vmul.f32 %v835_v10, %v780_v8  ;;  %v1387_v16 = vmul.f32 -1.442695, %v2595_v11  ;;  %v2598_v18 = vpop.f32.mrb[25].mxu0  ;;  %v865_v6 = vpop.permute.xlu1 %864 }
 0x21b   : > { %v1689_v4 = vpop.eup %1688  ;;  %1698 = vrcp.f32 %v720_v2  ;;  %v2600_v5 = vpop.f32.mrb[26].mxu0 }
 0x21c   : > { %v765_v19 = vmul.f32 %v1689_v4, %v2558_v12  ;;  %v921_v21 = vpack.c.bf16 %v892_v14, %v891_v13  ;;  %1700 = vpow2.f32 %v1387_v16  ;;  %v1388_v7 = vmul.f32 -1.442695, %v2600_v5  ;;  %v2604_v22 = vpop.f32.mrb[27].mxu0 }
 0x21d   : > { %v1691_v23 = vpop.eup %1690 }
 0x21e   : > { %v1693_v24 = vpop.eup %1692  ;;  %v781_v25 = vmul.f32 %v765_v19, %v2561_v15  ;;  %v766_v26 = vmul.f32 %v1691_v23, %v2563_v17  ;;  %1702 = vpow2.f32 %v1388_v7  ;;  %1444 = vmatprep.mubr.bf16.mxu1 %v921_v21  ;;  %v875_v4 = vpop.permute.xlu1 %874 }
 0x21f   : > { %v721_v27 = vadd.f32 1.0, %v1693_v24 }
 0x220   : > { %v1695_v28 = vpop.eup %1694  ;;  %v782_v29 = vmul.f32 %v766_v26, %v2566_v20  ;;  %v893_v35 = vmul.f32 %v840_v31, %v781_v25 }
 0x221   : > { %1704 = vrcp.f32 %v721_v27  ;;  %v722_v12 = vadd.f32 1.0, %v1695_v28  ;;  %v654_v33 = vpop.f32.mrb[28].mxu0 }
 0x222   : > { %v894_v36 = vmul.f32 %v845_v32, %v782_v29  ;;  %v1389_v38 = vmul.f32 -1.442695, %v654_v33  ;;  %v656_v39 = vpop.f32.mrb[29].mxu0  ;;  %v885_v29 = vpop.permute.xlu1 %884 }
 0x223   : > { %v1697_v41 = vpop.eup %1696  ;;  %1706 = vrcp.f32 %v722_v12  ;;  %v658_v15 = vpop.f32.mrb[30].mxu0  ;;  %v905_v12 = vld [vmem:[#allocation2 + $0x10] sm:$0xff] }
 0x224   : > { %v767_v17 = vmul.f32 %v1697_v41, %v2568_v30  ;;  %v922_v42 = vpack.c.bf16 %v894_v36, %v893_v35  ;;  %1708 = vpow2.f32 %v1389_v38  ;;  %v1390_v43 = vmul.f32 -1.442695, %v658_v15  ;;  %v660_v44 = vpop.f32.mrb[31].mxu0  ;;  %v906_v35 = vld [vmem:[#allocation2 + $0x18] sm:$0xff]  ;;  %v904_v41 = vld [vmem:[#allocation2 + $0x8] sm:$0xff] }
 0x225   : > { %v1699_v45 = vpop.eup %1698 }
 0x226   : > { %v1701_v20 = vpop.eup %1700  ;;  %v783_v46 = vmul.f32 %v767_v17, %v2571_v34  ;;  %v768_v47 = vmul.f32 %v1699_v45, %v2573_v37  ;;  %1710 = vpow2.f32 %v1390_v43  ;;  %1445 = vmatmul.mubr.bf16.gmra.mrb[4].mxu1 %v922_v42  ;;  %v909_v43 = vld [vmem:[#allocation2 + $0x30] sm:$0xff] }
 0x227   : > { %v723_v48 = vadd.f32 1.0, %v1701_v20  ;;  %v910_v20 = vld [vmem:[#allocation2 + $0x38] sm:$0xff] }
 0x228   : > { %v1703_v49 = vpop.eup %1702  ;;  %v784_v50 = vmul.f32 %v768_v47, %v2576_v40  ;;  %v895_v54 = vmul.f32 %v850_v52, %v783_v46 }
 0x229   : > { %1712 = vrcp.f32 %v723_v48  ;;  %v724_v30 = vadd.f32 1.0, %v1703_v49  ;;  %v908_v48 = vld [vmem:[#allocation2 + $0x28] sm:$0xff] }
 0x22a   : > { %v896_v56 = vmul.f32 %v855_v53, %v784_v50 }
 0x22b   : > { %v1705_v58 = vpop.eup %1704  ;;  %1714 = vrcp.f32 %v724_v30 }
 0x22c   : > { %v769_v59 = vmul.f32 %v1705_v58, %v2581_v51  ;;  %v923_v60 = vpack.c.bf16 %v896_v56, %v895_v54  ;;  %v913_v54 = vld [vmem:[#allocation2 + $0x50] sm:$0xff]  ;;  %v911_v56 = vld [vmem:[#allocation2 + $0x40] sm:$0xff] }
 0x22d   : > { %v1707_v34 = vpop.eup %1706 }
 0x22e   : > { %v1709_v62 = vpop.eup %1708  ;;  %v785_v37 = vmul.f32 %v769_v59, %v2584_v55  ;;  %v770_v63 = vmul.f32 %v1707_v34, %v2586_v57  ;;  %1448 = vmatprep.mubr.bf16.mxu1 %v923_v60  ;;  %v914_v59 = vld [vmem:[#allocation2 + $0x58] sm:$0xff] }
 0x22f   : > { %v725_v0 = vadd.f32 1.0, %v1709_v62  ;;  %v912_v62 = vld [vmem:[#allocation2 + $0x48] sm:$0xff] }
 0x230   : > { %v1711_v40 = vpop.eup %1710  ;;  %v786_v1 = vmul.f32 %v770_v63, %v2590_v61  ;;  %v897_v9 = vmul.f32 %v860_v3, %v785_v37  ;;  %v870_v61 = vpop.permute.xlu0 %869  ;;  %v917_v3 = vld [vmem:[#allocation2 + $0x70] sm:$0xff] }
 0x231   : > { %1716 = vrcp.f32 %v725_v0  ;;  %v726_v8 = vadd.f32 1.0, %v1711_v40 }
 0x232   : > { %v898_v2 = vmul.f32 %v865_v6, %v786_v1  ;;  %v915_v6 = vld [vmem:[#allocation2 + $0x60] sm:$0xff] }
 0x233   : > { %v1713_v10 = vpop.eup %1712  ;;  %1718 = vrcp.f32 %v726_v8 }
 0x234   : > { %v771_v51 = vmul.f32 %v1713_v10, %v2595_v11  ;;  %v924_v13 = vpack.c.bf16 %v898_v2, %v897_v9  ;;  %v880_v28 = vpop.permute.xlu0 %879  ;;  %v918_v9 = vld [vmem:[#allocation2 + $0x78] sm:$0xff] }
 0x235   : > { %v1715_v14 = vpop.eup %1714 }
 0x236   : > { %v787_v55 = vmul.f32 %v771_v51, %v2598_v18  ;;  %v772_v57 = vmul.f32 %v1715_v14, %v2600_v5  ;;  %1449 = vmatmul.mubr.bf16.gmra.mrb[8].mxu1 %v924_v13  ;;  %v916_v51 = vld [vmem:[#allocation2 + $0x68] sm:$0xff] }
 0x238   : > { %v788_v16 = vmul.f32 %v772_v57, %v2604_v22  ;;  %v899_v19 = vmul.f32 %v870_v61, %v787_v55  ;;  %v903_v22 = vld [vmem:[#allocation2] sm:$0xff] }
 0x23a   : > { %v900_v21 = vmul.f32 %v875_v4, %v788_v16 }
 0x23b   : > { %v1717_v7 = vpop.eup %1716 }
 0x23c   : > { %v925_v23 = vpack.c.bf16 %v900_v21, %v899_v19  ;;  %v773_v24 = vmul.f32 %v1717_v7, %v654_v33 }
 0x23d   : > { %v1719_v25 = vpop.eup %1718 }
 0x23e   : > { %v789_v26 = vmul.f32 %v773_v24, %v656_v39  ;;  %v774_v27 = vmul.f32 %v1719_v25, %v658_v15  ;;  %1452 = vmatprep.mubr.bf16.mxu1 %v925_v23 }
 0x240   : > { %v790_v11 = vmul.f32 %v774_v27, %v660_v44  ;;  %v901_v18 = vmul.f32 %v880_v28, %v789_v26  ;;  %v907_v44 = vld [vmem:[#allocation2 + $0x20] sm:$0xff] }
 0x242   : > { %v902_v31 = vmul.f32 %v885_v29, %v790_v11 }
 0x244   : > { %v926_v5 = vpack.c.bf16 %v902_v31, %v901_v18 }
 0x246   : > { %1453 = vmatmul.mubr.bf16.gmra.mrb[12].mxu1 %v926_v5 }
 0x2e9   : > { %v1442_v32 = vpop.f32.mrb[0].mxu1 }
 0x2ea   : > { %v1090_v36 = vadd.f32 %v1442_v32, %v905_v12  ;;  %v1025_v38 = vpop.f32.mrb[1].mxu1 }
 0x2eb   : > { %v1088_v17 = vadd.f32 %v1025_v38, %v903_v22  ;;  %v1443_v33 = vpop.f32.mrb[2].mxu1 }
 0x2ec   : > { %1106 = vst [vmem:[#allocation2 + $0x10] sm:$0xff] %v1090_v36  ;;  %v1091_v39 = vadd.f32 %v1443_v33, %v906_v35  ;;  %v1028_v15 = vpop.f32.mrb[3].mxu1 }
 0x2ed   : > { %1104 = vst [vmem:[#allocation2] sm:$0xff] %v1088_v17  ;;  %v1089_v42 = vadd.f32 %v1028_v15, %v904_v41 }
 0x2ee   : > { %1107 = vst [vmem:[#allocation2 + $0x18] sm:$0xff] %v1091_v39 }
 0x2ef   : > { %1105 = vst [vmem:[#allocation2 + $0x8] sm:$0xff] %v1089_v42 }
 0x2f3   : > { %v1126_v19 = vld [vmem:[#allocation2 + $0x10] sm:$0xff] (!%p1399_p0) }
 0x2f4   : > { %v1124_v61 = vld [vmem:[#allocation2] sm:$0xff] (!%p1399_p0)  ;;  %1142 = vst [vmem:[%s2480_s18 + $0x10] sm:$0xff] (!%p1399_p0), %v1126_v19 }
 0x2f5   : > { %1140 = vst [vmem:[%s2480_s18] sm:$0xff] (!%p1399_p0), %v1124_v61  ;;  %v1127_v21 = vld [vmem:[#allocation2 + $0x18] sm:$0xff] (!%p1399_p0) }
 0x2f6   : > { %v1125_v4 = vld [vmem:[#allocation2 + $0x8] sm:$0xff] (!%p1399_p0)  ;;  %1143 = vst [vmem:[%s2480_s18 + $0x18] sm:$0xff] (!%p1399_p0), %v1127_v21 }
 0x2f7   : > { %1141 = vst [vmem:[%s2480_s18 + $0x8] sm:$0xff] (!%p1399_p0), %v1125_v4 }
 0x2f9   : > { %v1446_v45 = vpop.f32.mrb[4].mxu1 }
 0x2fa   : > { %v1094_v46 = vadd.f32 %v1446_v45, %v909_v43  ;;  %v1041_v47 = vpop.f32.mrb[5].mxu1 }
 0x2fb   : > { %v1092_v49 = vadd.f32 %v1041_v47, %v907_v44  ;;  %v1447_v50 = vpop.f32.mrb[6].mxu1 }
 0x2fc   : > { %1110 = vst [vmem:[#allocation2 + $0x30] sm:$0xff] %v1094_v46  ;;  %v1095_v52 = vadd.f32 %v1447_v50, %v910_v20  ;;  %v1044_v53 = vpop.f32.mrb[7].mxu1 }
 0x2fd   : > { %1108 = vst [vmem:[#allocation2 + $0x20] sm:$0xff] %v1092_v49  ;;  %v1093_v30 = vadd.f32 %v1044_v53, %v908_v48 }
 0x2fe   : > { %1111 = vst [vmem:[#allocation2 + $0x38] sm:$0xff] %v1095_v52 }
 0x2ff   : > { %1109 = vst [vmem:[#allocation2 + $0x28] sm:$0xff] %v1093_v30 }
 0x303   : > { %v1130_v24 = vld [vmem:[#allocation2 + $0x30] sm:$0xff] (!%p1399_p0) }
 0x304   : > { %v1128_v7 = vld [vmem:[#allocation2 + $0x20] sm:$0xff] (!%p1399_p0)  ;;  %1146 = vst [vmem:[%s2480_s18 + $0x30] sm:$0xff] (!%p1399_p0), %v1130_v24 }
 0x305   : > { %1144 = vst [vmem:[%s2480_s18 + $0x20] sm:$0xff] (!%p1399_p0), %v1128_v7  ;;  %v1131_v25 = vld [vmem:[#allocation2 + $0x38] sm:$0xff] (!%p1399_p0) }
 0x306   : > { %v1129_v23 = vld [vmem:[#allocation2 + $0x28] sm:$0xff] (!%p1399_p0)  ;;  %1147 = vst [vmem:[%s2480_s18 + $0x38] sm:$0xff] (!%p1399_p0), %v1131_v25 }
 0x307   : > { %1145 = vst [vmem:[%s2480_s18 + $0x28] sm:$0xff] (!%p1399_p0), %v1129_v23 }
 0x309   : > { %v1450_v58 = vpop.f32.mrb[8].mxu1 }
 0x30a   : > { %v1098_v60 = vadd.f32 %v1450_v58, %v913_v54  ;;  %v1057_v34 = vpop.f32.mrb[9].mxu1 }
 0x30b   : > { %v1096_v37 = vadd.f32 %v1057_v34, %v911_v56  ;;  %v1451_v63 = vpop.f32.mrb[10].mxu1 }
 0x30c   : > { %1114 = vst [vmem:[#allocation2 + $0x50] sm:$0xff] %v1098_v60  ;;  %v1099_v0 = vadd.f32 %v1451_v63, %v914_v59  ;;  %v1060_v40 = vpop.f32.mrb[11].mxu1 }
 0x30d   : > { %1112 = vst [vmem:[#allocation2 + $0x40] sm:$0xff] %v1096_v37  ;;  %v1097_v1 = vadd.f32 %v1060_v40, %v912_v62 }
 0x30e   : > { %1115 = vst [vmem:[#allocation2 + $0x58] sm:$0xff] %v1099_v0 }
 0x30f   : > { %1113 = vst [vmem:[#allocation2 + $0x48] sm:$0xff] %v1097_v1 }
 0x313   : > { %v1134_v11 = vld [vmem:[#allocation2 + $0x50] sm:$0xff] (!%p1399_p0) }
 0x314   : > { %v1132_v26 = vld [vmem:[#allocation2 + $0x40] sm:$0xff] (!%p1399_p0)  ;;  %1150 = vst [vmem:[%s2480_s18 + $0x50] sm:$0xff] (!%p1399_p0), %v1134_v11 }
 0x315   : > { %1148 = vst [vmem:[%s2480_s18 + $0x40] sm:$0xff] (!%p1399_p0), %v1132_v26  ;;  %v1135_v28 = vld [vmem:[#allocation2 + $0x58] sm:$0xff] (!%p1399_p0) }
 0x316   : > { %v1133_v27 = vld [vmem:[#allocation2 + $0x48] sm:$0xff] (!%p1399_p0)  ;;  %1151 = vst [vmem:[%s2480_s18 + $0x58] sm:$0xff] (!%p1399_p0), %v1135_v28 }
 0x317   : > { %1149 = vst [vmem:[%s2480_s18 + $0x48] sm:$0xff] (!%p1399_p0), %v1133_v27 }
 0x319   : > { %v1454_v8 = vpop.f32.mrb[12].mxu1  ;;  %1123 = sbr.rel (%p1399_p0) target bundleno = 808 (0x328), region = 60 }
 0x31a   : > { %v1102_v2 = vadd.f32 %v1454_v8, %v917_v3  ;;  %v1073_v10 = vpop.f32.mrb[13].mxu1 }
 0x31b   : > { %v1100_v13 = vadd.f32 %v1073_v10, %v915_v6  ;;  %v1455_v14 = vpop.f32.mrb[14].mxu1 }
 0x31c   : > { %1118 = vst [vmem:[#allocation2 + $0x70] sm:$0xff] %v1102_v2  ;;  %v1103_v55 = vadd.f32 %v1455_v14, %v918_v9  ;;  %v1076_v57 = vpop.f32.mrb[15].mxu1 }
 0x31d   : > { %1116 = vst [vmem:[#allocation2 + $0x60] sm:$0xff] %v1100_v13  ;;  %v1101_v16 = vadd.f32 %v1076_v57, %v916_v51 }
 0x31e   : > { %1119 = vst [vmem:[#allocation2 + $0x78] sm:$0xff] %v1103_v55 }
 0x31f   : > { %1117 = vst [vmem:[#allocation2 + $0x68] sm:$0xff] %v1101_v16 }
 0x323   : > { %v1138_v31 = vld [vmem:[#allocation2 + $0x70] sm:$0xff] }
 0x324   : > { %v1136_v29 = vld [vmem:[#allocation2 + $0x60] sm:$0xff]  ;;  %1154 = vst [vmem:[%s2480_s18 + $0x70] sm:$0xff] %v1138_v31 }
 0x325   : > { %1152 = vst [vmem:[%s2480_s18 + $0x60] sm:$0xff] %v1136_v29  ;;  %v1139_v5 = vld [vmem:[#allocation2 + $0x78] sm:$0xff] }
 0x326   : > { %v1137_v18 = vld [vmem:[#allocation2 + $0x68] sm:$0xff]  ;;  %1155 = vst [vmem:[%s2480_s18 + $0x78] sm:$0xff] %v1139_v5 }
 0x327   : > { %1153 = vst [vmem:[%s2480_s18 + $0x68] sm:$0xff] %v1137_v18 }
 0x328 PF: > { %s2802_s2 = sld [smem:[#allocation28_spill]]  ;;  %s2803_s19 = sld [smem:[#allocation29_spill]] }
 0x329   : > { %s2804_s5 = sld [smem:[#allocation38_spill]]  ;;  %s1170_s3 = sshll.u32 %s2480_s18, 4  ;;  %s2645_s3 = int_to_ptr.vmem [resolvable:$true] %s1170_s3 }
 0x32a   : > { %s1157_s23 = scalar_lea.sflag [#allocation7], %s2448_s20  ;;  %s1850_s12 = scalar_lea.vmem %s2645_s3, 2048 }
 0x32b   : > { %p1851_p11 = scmp.ne.s32.totalorder %s2645_s3, %s1850_s12  ;;  %s2023_s0 = smov [#allocation13]  }
 0x32c   : > { %s1854_s26 = sshll.u32 %s2023_s0, 4  ;;  %s1855_s26 = int_to_ptr.vmem [resolvable:$false] %s1854_s26 }
 0x32d   : > { %s1856_s28 = scalar_lea.vmem %s1855_s26, 4096  ;;  %p1857_p8 = scmp.lt.s32.totalorder %s2645_s3, %s1855_s26 }
 0x32e   : > { %s1407_s10 = sshll.u32 %s2802_s2, 11  ;;  %p2805_p6 = scmp.ne.s32.totalorder %s2803_s19, 0 }
 0x32f   : > { %s2642_s8 = scalar_lea.hbm %s2804_s5, %s1407_s10  ;;  %p1858_p9 = scmp.lt.s32.totalorder %s1856_s28, %s1850_s12 }
 0x330   : > { %p1852_p4 = pnand %p1851_p11, %p2805_p6 }
 0x331   : > { %p1859_p12 = por %p1858_p9, %p1857_p8 }
 0x332   : > { %p1853_p7 = pneg %p1852_p4 }
 0x334   : > { %p1860_p1 = pnand %p1859_p12, %p1853_p7 }
 0x336   : > { %1863 = shalt.err (!%p1860_p1)
}
 0x337   : > { %s1864_s16 = scalar_lea.hbm %s2642_s8, 2048  ;;  %s1868_s22 = scalar_lea.hbm %s2804_s5, 28672 }
 0x338   : > { %p1865_p3 = scmp.ne.s32.totalorder %s2642_s8, %s1864_s16  ;;  %p1869_p10 = scmp.lt.u32.totalorder %s2642_s8, %s2804_s5 }
 0x339   : > { %p1870_p2 = scmp.lt.u32.totalorder %s1868_s22, %s1864_s16  ;;  %p1872_p11 = scmp.lt.u32.totalorder %s1864_s16, %s2642_s8 }
 0x33a   : > { %p1866_p13 = pnand %p1865_p3, %p2805_p6 }
 0x33b   : > { %p1871_p0 = por %p1870_p2, %p1869_p10 }
 0x33c   : > { %p1867_p5 = pneg %p1866_p13 }
 0x33d   : > { %p1873_p4 = por %p1872_p11, %p1871_p0 }
 0x33f   : > { %p1874_p7 = pnand %p1873_p4, %p1867_p5 }
 0x341   : > { %1877 = shalt.err (!%p1874_p7)
}
 0x342   : > { %s2024_s1 = smov 128   ;;  %s2025_s2 = smov 8  }
 0x343   : > { %1468 = dma.vmem_to_hbm [thread:$0]  (%p2805_p6), %s2645_s3, 2048, %s2642_s8, %s1157_s23, %s2024_s1, %s2024_s1, %s2025_s2  }
 0x344 PF: > { %s2806_s10 = sld [smem:[#allocation25_spill]]  ;;  %s2807_s6 = sld [smem:[#allocation30_spill]] }
 0x345   : > { %p1492_p8 = scmp.ge.s32.totalorder %s2010_s15, 2 }
 0x34a   : > { %s1185_s25 = sand.u32 1, %s2806_s10   ;;  %p2808_p9 = scmp.ne.s32.totalorder %s2807_s6, 0 }
 0x34b   : > { %s1186_s12 = scalar_lea.sflag [#allocation7], %s1185_s25 }
 0x34c   : > { %p1488_p12 = pnand %p1492_p8, %p2808_p9 }
 0x34e   : > { %1953 = dma.done.wait (!%p1488_p12), %s1186_s12, 2048  }
 0x34f   : > { %1955 = vsyncadd (!%p1488_p12), %s1186_s12, 4294965248  ;;  %s31_s15 = sadd.s32 1, %s2010_s15   ;;  %s2810_s6 = sld [smem:[#allocation24_spill]] }
 0x350   : > { %p2676_p1 = scmp.ge.s32.totalorder %s31_s15, 30   ;;  %s2811_s20 = sld [smem:[#allocation26_spill]] }
 0x351   : > { %s2812_s10 = sld [smem:[#allocation34_spill]]  ;;  %s2813_s19 = sld [smem:[#allocation31_spill]] }
 0x352   : > { %s2814_s3 = sld [smem:[#allocation32_spill]]  ;;  %s2816_s28 = smov %s1962_s29 }
 0x353   : > { %s2817_s29 = smov %s1966_s30  ;;  %s2818_s30 = smov %s2387_s17 }
 0x354   : > { %s2819_s0 = smov %s1978_s7  ;;  %s2820_s7 = smov %s2317_s27 }
 0x355   : > { %s2821_s8 = smov %s1986_s9  ;;  %s2823_s11 = smov %s2002_s13 }
 0x356   : > { %s2822_s9 = smov %s2811_s20  ;;  %s2824_s12 = smov %s2006_s14 }
 0x357   : > { %s2825_s13 = smov %s2813_s19  ;;  %30 = sbr.rel (!%p2676_p1) target bundleno = 27 (0x1b), region = 126 }
 0x358   : > { %s2826_s14 = smov %s2814_s3 }
 0x35e   :  { %1191 = vsyncpa [#allocation6], 1 }
 0x35f   :  { %1193 = vsyncpa [#allocation6 + $0x1], 1 }
 0x360   :  { %1194 = vsyncpa [#allocation9], 1 }
 0x361   :  { %1196 = vsyncpa [#allocation9 + $0x1], 1 }
 0x362   :  { %1197 = vsyncpa [#allocation12], 1 }
 0x363   :  { %1199 = vsyncpa [#allocation12 + $0x1], 1 }
 0x364   :  { %1200 = vsyncpa [#allocation7], 1 }
 0x365   :  { %1202 = vsyncpa [#allocation7 + $0x1], 1 }

</bundles_post_ra>
